<compile_context>
chip_gen: v5e
topology: v5e:2x2
jax: 0.10.0
libtpu: 0.0.40
codegen_flags: <defaults>
</compile_context>

<pallas_src>
import jax
import jax.numpy as jnp
from jax import lax
from jax.experimental import pallas as pl
from jax.experimental.pallas import tpu as pltpu

DIM = 256          # self.dim
FC_HIDDEN = 128
C_IN = 2
EPS = 1e-5


# --------------------------------------------------------------------------
# Pallas kernel: one block of BB batch samples per grid step.
# Activations live as (L*BB, DIM) slabs (row = position*BB + sample), so the
# stride-2 tap gather of the next conv is a whole-tile leading-dim slice.
# --------------------------------------------------------------------------
def _ad_classifier_kernel(p1_ref, w1_ref, b1_ref,
                          w2_ref, b2_ref,
                          w3_ref, b3_ref,
                          wf1_ref, bf_ref, wf2_ref, bf2_ref,
                          out_ref):
    f32 = jnp.float32
    bf16 = jnp.bfloat16

    def bias_relu(y, b_ref):
        # BN scale is folded into the weights; eval-mode BN = bias-add + ReLU.
        # Arithmetic in f32 (MXU accumulator dtype), cast once to bf16 on write.
        return jnp.maximum(y + b_ref[...], 0.0).astype(bf16)

    # ---- conv1: im2col patches built in the wrapper (K padded 6 -> 8) -------
    p1 = p1_ref[0]                                          # (L1, BB, 8) bf16
    l1, bb, _ = p1.shape
    h = jnp.dot(p1.reshape(l1 * bb, 8), w1_ref[...],
                preferred_element_type=f32)                 # (L1*BB, DIM) f32
    h = bias_relu(h, b1_ref)                                # (L1*BB, DIM) bf16

    # ---- conv2/conv3: stride-2, k=3, pad=1 conv as 3 accumulating dots ------
    def conv_bias_relu(h_flat, l_in, w_ref, b_ref):
        l_out = l_in // 2
        dim = h_flat.shape[-1]
        # rows are position-major, sample-minor: row = l*BB + b
        h4 = h_flat.reshape(l_out, 2, bb, dim)
        even = h4[:, 0]                                     # x[2t]     (tap k=1)
        odd = h4[:, 1]                                      # x[2t + 1] (tap k=2)
        zrow = jnp.zeros((1, bb, dim), h_flat.dtype)
        if l_out > 1:                                       # x[2t - 1] (tap k=0)
            prev = jnp.concatenate([zrow, odd[:l_out - 1]], axis=0)
        else:
            prev = zrow
        # Three K=DIM MXU dots sharing one f32 accumulator: same MXU passes as
        # a single K=3*DIM dot, but no (l_out*BB, 3*DIM) concat temp.
        acc = jnp.dot(prev.reshape(l_out * bb, dim), w_ref[0],
                      preferred_element_type=f32)
        acc += jnp.dot(even.reshape(l_out * bb, dim), w_ref[1],
                       preferred_element_type=f32)
        acc += jnp.dot(odd.reshape(l_out * bb, dim), w_ref[2],
                       preferred_element_type=f32)
        return bias_relu(acc, b_ref), l_out                 # (l_out*BB, DIM) bf16

    h, l2 = conv_bias_relu(h, l1, w2_ref, b2_ref)           # (L2*BB, DIM)
    h, l3 = conv_bias_relu(h, l2, w3_ref, b3_ref)           # (L3*BB, DIM)

    # ---- temporal mean pool (x.mean(dim=-1) over the L3 conv positions) -----
    dim = h.shape[-1]
    pooled = jnp.mean(h.reshape(l3, bb, dim).astype(f32), axis=0)   # (BB, DIM)

    # ---- fc head: Linear(256->128) -> BN -> ReLU -> Linear(128->1) ----------
    z = jnp.dot(pooled.astype(bf16), wf1_ref[...],
                preferred_element_type=f32)                 # (BB, 128) f32
    z = jnp.maximum(z + bf_ref[...], 0.0)                   # keep f32 (tiny)
    # fc2 as a lane reduction (VPU/XLU) instead of a padded MXU matmul
    logit = jnp.sum(z * wf2_ref[...], axis=-1)              # (BB,)
    out_ref[0] = logit[None, :] + bf2_ref[...]              # (1, BB) dense row


# --------------------------------------------------------------------------
# Parameter setup (deterministic, synthetic) and glue.
# --------------------------------------------------------------------------
def init_params(key):
    ks = jax.random.split(key, 10)

    def conv_w(k, o, c):
        return jax.random.normal(k, (o, c, 3), jnp.float32) * (2.0 / (c * 3)) ** 0.5

    def bn(k, c):
        k1, k2, k3, k4 = jax.random.split(k, 4)
        gamma = 1.0 + 0.1 * jax.random.normal(k1, (c,), jnp.float32)
        beta = 0.1 * jax.random.normal(k2, (c,), jnp.float32)
        mean = 0.1 * jax.random.normal(k3, (c,), jnp.float32)
        var = jax.random.uniform(k4, (c,), jnp.float32, minval=0.5, maxval=1.5)
        return (gamma, beta, mean, var)

    return dict(
        conv1_w=conv_w(ks[0], DIM, C_IN),
        bn1=bn(ks[1], DIM),
        conv2_w=conv_w(ks[2], DIM, DIM),
        bn2=bn(ks[3], DIM),
        conv3_w=conv_w(ks[4], DIM, DIM),
        bn3=bn(ks[5], DIM),
        fc1_w=jax.random.normal(ks[6], (FC_HIDDEN, DIM), jnp.float32) * (1.0 / DIM) ** 0.5,
        bnf=bn(ks[7], FC_HIDDEN),
        fc2_w=jax.random.normal(ks[8], (1, FC_HIDDEN), jnp.float32) * (1.0 / FC_HIDDEN) ** 0.5,
        fc2_b=0.1 * jax.random.normal(ks[9], (1,), jnp.float32),
    )


def _bn_fold(bn_params):
    gamma, beta, mean, var = bn_params
    scale = gamma / jnp.sqrt(var + EPS)
    bias = beta - mean * scale
    return scale.astype(jnp.float32), bias.astype(jnp.float32)


def ad_classifier_forward(x, params, block_b=128,
                          vmem_limit_bytes=64 * 1024 * 1024):
    """x: (B, L, 2) float32  ->  (B, 1) float32 (eval-mode BatchNorm).

    block_b: samples per grid step.  Production guidance: pick it so the
    smallest matmul M (= L3*block_b = L/8 * block_b) is a multiple of 128 (v5e)
    or 256 (v6e/v7x), and keep nb = B_pad/block_b >= 2 (even on v7x) so the
    "parallel" batch axis feeds both TensorCores.  It is clamped to the padded
    batch so small test shapes still run.  Raise vmem_limit_bytes with block_b
    (~64-96 MiB on v5e/v6e; stay <= ~48 MiB of v7x's 64 MiB).
    """
    B, L, c_in = x.shape
    assert c_in == C_IN
    assert L % 8 == 0, "kernel assumes L divisible by 8 (3 stride-2 convs)"
    B8 = ((B + 7) // 8) * 8
    BB = max(8, min((block_b // 8) * 8, B8))
    L1, L2, L3 = L // 2, L // 4, L // 8

    B_pad = ((B + BB - 1) // BB) * BB
    nb = B_pad // BB

    xf = x.astype(jnp.float32)
    if B_pad != B:
        xf = jnp.pad(xf, ((0, B_pad - B), (0, 0), (0, 0)))

    # --- glue: im2col patches for conv1 (k-major, c-minor), K padded 6 -> 8,
    #           laid out (nb, L1, BB, 8) bf16 so the kernel sees position-major
    #           rows and the only per-step HBM stream is half-width.
    # TODO(synk): the trailing dim 8 (< 128 lanes) wastes 16x VMEM inside the
    # double-buffered p1 block; if L1*BB ever grows enough to make this the
    # v7x VMEM limiter, repack taps/samples into lanes instead.
    xp = jnp.pad(xf, ((0, 0), (1, 1), (0, 0)))
    idx = 2 * jnp.arange(L1)[:, None] + jnp.arange(3)[None, :]      # (L1, 3)
    p1 = xp[:, idx, :].reshape(B_pad, L1, 3 * C_IN)
    p1 = jnp.pad(p1, ((0, 0), (0, 0), (0, 8 - 3 * C_IN)))
    p1 = p1.reshape(nb, BB, L1, 8).transpose(0, 2, 1, 3).astype(jnp.bfloat16)

    # --- glue: fold BN scale into bf16 weight columns; pass f32 bias rows -----
    s1, b1 = _bn_fold(params["bn1"])
    s2, b2 = _bn_fold(params["bn2"])
    s3, b3 = _bn_fold(params["bn3"])
    sf, bf = _bn_fold(params["bnf"])

    w1 = jnp.transpose(params["conv1_w"], (2, 1, 0)).reshape(3 * C_IN, DIM)
    w1 = jnp.pad(w1, ((0, 8 - 3 * C_IN), (0, 0)))
    w1 = (w1 * s1[None, :]).astype(jnp.bfloat16)                     # (8, DIM)
    w2 = (jnp.transpose(params["conv2_w"], (2, 1, 0))
          * s2[None, None, :]).astype(jnp.bfloat16)                  # (3, DIM, DIM)
    w3 = (jnp.transpose(params["conv3_w"], (2, 1, 0))
          * s3[None, None, :]).astype(jnp.bfloat16)                  # (3, DIM, DIM)
    wf1 = (params["fc1_w"].T * sf[None, :]).astype(jnp.bfloat16)     # (DIM, 128)

    b1 = b1.reshape(1, DIM)
    b2 = b2.reshape(1, DIM)
    b3 = b3.reshape(1, DIM)
    bf = bf.reshape(1, FC_HIDDEN)
    wf2 = params["fc2_w"].astype(jnp.float32)                        # (1, 128)
    bf2 = params["fc2_b"].reshape(1, 1).astype(jnp.float32)          # (1, 1)

    def const_spec(shape):
        nd = len(shape)
        return pl.BlockSpec(shape, lambda i, _nd=nd: (0,) * _nd)

    flops = int(2 * B_pad * (L1 * 8 * DIM
                             + L2 * 3 * DIM * DIM
                             + L3 * 3 * DIM * DIM
                             + DIM * FC_HIDDEN
                             + FC_HIDDEN))
    weight_bytes = sum(int(a.size) * a.dtype.itemsize
                       for a in (w1, w2, w3, wf1, b1, b2, b3, bf, wf2, bf2))
    bytes_accessed = int(p1.size * 2 + weight_bytes + B_pad * 4)

    out = pl.pallas_call(
        _ad_classifier_kernel,
        out_shape=jax.ShapeDtypeStruct((nb, 1, BB), jnp.float32),
        grid=(nb,),
        in_specs=[
            pl.BlockSpec((1, L1, BB, 8), lambda i: (i, 0, 0, 0)),   # p1 patches
            const_spec((8, DIM)),                                   # w1 (scale-folded)
            const_spec((1, DIM)),                                   # b1
            const_spec((3, DIM, DIM)),                              # w2 (scale-folded)
            const_spec((1, DIM)),                                   # b2
            const_spec((3, DIM, DIM)),                              # w3 (scale-folded)
            const_spec((1, DIM)),                                   # b3
            const_spec((DIM, FC_HIDDEN)),                           # wf1 (scale-folded)
            const_spec((1, FC_HIDDEN)),                             # bf
            const_spec((1, FC_HIDDEN)),                             # wf2 row
            const_spec((1, 1)),                                     # fc2 bias
        ],
        out_specs=pl.BlockSpec((1, 1, BB), lambda i: (i, 0, 0)),
        compiler_params=pltpu.CompilerParams(
            dimension_semantics=("parallel",),
            vmem_limit_bytes=int(vmem_limit_bytes)),
        cost_estimate=pl.CostEstimate(flops=flops, transcendentals=0,
                                      bytes_accessed=bytes_accessed),
    )(p1, w1, b1, w2, b2, w3, b3, wf1, bf, wf2, bf2)

    return out.reshape(B_pad, 1)[:B]                                 # (B, 1)


# --------------------------------------------------------------------------
# Pure-JAX f32 reference (eval-mode BN), for the correctness check.
# --------------------------------------------------------------------------
def reference_forward(x, params):
    h = jnp.transpose(x, (0, 2, 1))                                  # (B, 2, L)
    for wname, bnname in (("conv1_w", "bn1"), ("conv2_w", "bn2"), ("conv3_w", "bn3")):
        h = lax.conv_general_dilated(
            h, params[wname], window_strides=(2,), padding=((1, 1),),
            dimension_numbers=("NCH", "OIH", "NCH"),
            precision=lax.Precision.HIGHEST)
        s, b = _bn_fold(params[bnname])
        h = jnp.maximum(h * s[None, :, None] + b[None, :, None], 0.0)
    pooled = h.mean(axis=-1)                                         # (B, DIM)
    z = jnp.dot(pooled, params["fc1_w"].T, precision=lax.Precision.HIGHEST)
    sf, bf = _bn_fold(params["bnf"])
    z = jnp.maximum(z * sf[None, :] + bf[None, :], 0.0)
    return (jnp.dot(z, params["fc2_w"].T, precision=lax.Precision.HIGHEST)
            + params["fc2_b"][None, :])


if __name__ == "__main__":
    key = jax.random.PRNGKey(0)
    kp, kx = jax.random.split(key)
    params = init_params(kp)

    B, L = 16, 16                                                    # x: (B, L, 2)
    x = jax.random.normal(kx, (B, L, C_IN), jnp.float32)

    # block_b=8 keeps two grid steps at this tiny test shape; raise it (and
    # vmem_limit_bytes if needed) for production batches per the docstring.
    out = jax.block_until_ready(ad_classifier_forward(x, params, block_b=8))
    assert out.shape == (B, 1)

    ref = reference_forward(x, params)
    # tolerance accounts for bf16 patches/activations/weights (f32 accumulation)
    if not jnp.allclose(out, ref, rtol=5e-2, atol=5e-2):
        diff = jnp.max(jnp.abs(out - ref))
        raise AssertionError(
            f"mismatch (max abs diff {diff}): kernel={out.ravel()} ref={ref.ravel()}")

    print("KERNEL_OK")
</pallas_src>

<mosaic_0001>
module attributes {stable_mosaic.version = 11 : i64} {
  func.func @_ad_classifier_kernel(%arg0: i32, %arg1: memref<1x8x8x8xbf16, #tpu.memory_space<vmem>>, %arg2: memref<8x256xbf16, #tpu.memory_space<vmem>>, %arg3: memref<1x256xf32, #tpu.memory_space<vmem>>, %arg4: memref<3x256x256xbf16, #tpu.memory_space<vmem>>, %arg5: memref<1x256xf32, #tpu.memory_space<vmem>>, %arg6: memref<3x256x256xbf16, #tpu.memory_space<vmem>>, %arg7: memref<1x256xf32, #tpu.memory_space<vmem>>, %arg8: memref<256x128xbf16, #tpu.memory_space<vmem>>, %arg9: memref<1x128xf32, #tpu.memory_space<vmem>>, %arg10: memref<1x128xf32, #tpu.memory_space<vmem>>, %arg11: memref<1x1xf32, #tpu.memory_space<vmem>>, %arg12: memref<1x1x8xf32, #tpu.memory_space<vmem>>) attributes {dimension_semantics = [#tpu.dimension_semantics<parallel>], iteration_bounds = array<i64: 2>, scalar_prefetch = 0 : i64, scratch_operands = 0 : i64, tpu.core_type = #tpu.core_type<tc>, window_params = [{transform_indices = @transform_0, window_bounds = array<i64: 1, 8, 8, 8>}, {pipeline_mode = #tpu.pipeline_mode<synchronous>, transform_indices = @transform_1, window_bounds = array<i64: 8, 256>}, {pipeline_mode = #tpu.pipeline_mode<synchronous>, transform_indices = @transform_2, window_bounds = array<i64: 1, 256>}, {pipeline_mode = #tpu.pipeline_mode<synchronous>, transform_indices = @transform_3, window_bounds = array<i64: 3, 256, 256>}, {pipeline_mode = #tpu.pipeline_mode<synchronous>, transform_indices = @transform_4, window_bounds = array<i64: 1, 256>}, {pipeline_mode = #tpu.pipeline_mode<synchronous>, transform_indices = @transform_5, window_bounds = array<i64: 3, 256, 256>}, {pipeline_mode = #tpu.pipeline_mode<synchronous>, transform_indices = @transform_6, window_bounds = array<i64: 1, 256>}, {pipeline_mode = #tpu.pipeline_mode<synchronous>, transform_indices = @transform_7, window_bounds = array<i64: 256, 128>}, {pipeline_mode = #tpu.pipeline_mode<synchronous>, transform_indices = @transform_8, window_bounds = array<i64: 1, 128>}, {pipeline_mode = #tpu.pipeline_mode<synchronous>, transform_indices = @transform_9, window_bounds = array<i64: 1, 128>}, {pipeline_mode = #tpu.pipeline_mode<synchronous>, transform_indices = @transform_10, window_bounds = array<i64: 1, 1>}, {transform_indices = @transform_11, window_bounds = array<i64: 1, 1, 8>}]} {
    %c0 = arith.constant 0 : index
    %c0_0 = arith.constant 0 : index
    %c0_1 = arith.constant 0 : index
    %c0_2 = arith.constant 0 : index
    %0 = vector.load %arg1[%c0, %c0_0, %c0_1, %c0_2] : memref<1x8x8x8xbf16, #tpu.memory_space<vmem>>, vector<1x8x8x8xbf16>
    %1 = vector.shape_cast %0 : vector<1x8x8x8xbf16> to vector<8x8x8xbf16>
    %2 = vector.shape_cast %1 : vector<8x8x8xbf16> to vector<64x8xbf16>
    %c0_3 = arith.constant 0 : index
    %c0_4 = arith.constant 0 : index
    %3 = vector.load %arg2[%c0_3, %c0_4] : memref<8x256xbf16, #tpu.memory_space<vmem>>, vector<8x256xbf16>
    %cst = arith.constant dense<0.000000e+00> : vector<64x256xf32>
    %4 = tpu.matmul %2, %3, %cst {dimension_numbers = #tpu.dot_dimension_numbers<[1], [0], [0], [1], [0, 0, 1, 1], [], []>} : vector<64x8xbf16>, vector<8x256xbf16>, vector<64x256xf32> -> vector<64x256xf32>
    %c0_5 = arith.constant 0 : index
    %c0_6 = arith.constant 0 : index
    %5 = vector.load %arg3[%c0_5, %c0_6] : memref<1x256xf32, #tpu.memory_space<vmem>>, vector<1x256xf32>
    %6 = vector.broadcast %5 : vector<1x256xf32> to vector<64x256xf32>
    %7 = arith.addf %4, %6 : vector<64x256xf32>
    %cst_7 = arith.constant 0.000000e+00 : f32
    %8 = vector.broadcast %cst_7 : f32 to vector<64x256xf32>
    %9 = arith.maximumf %7, %8 : vector<64x256xf32>
    %10 = arith.truncf %9 : vector<64x256xf32> to vector<64x256xbf16>
    %11 = vector.shape_cast %10 : vector<64x256xbf16> to vector<4x2x8x256xbf16>
    %12 = vector.extract_strided_slice %11 {offsets = [0, 0, 0, 0], sizes = [4, 1, 8, 256], strides = [1, 1, 1, 1]} : vector<4x2x8x256xbf16> to vector<4x1x8x256xbf16>
    %13 = vector.shape_cast %12 : vector<4x1x8x256xbf16> to vector<4x8x256xbf16>
    %14 = vector.extract_strided_slice %11 {offsets = [0, 1, 0, 0], sizes = [4, 1, 8, 256], strides = [1, 1, 1, 1]} : vector<4x2x8x256xbf16> to vector<4x1x8x256xbf16>
    %15 = vector.shape_cast %14 : vector<4x1x8x256xbf16> to vector<4x8x256xbf16>
    %cst_8 = arith.constant 0.000000e+00 : bf16
    %16 = vector.broadcast %cst_8 : bf16 to vector<1x8x256xbf16>
    %17 = vector.extract_strided_slice %15 {offsets = [0, 0, 0], sizes = [3, 8, 256], strides = [1, 1, 1]} : vector<4x8x256xbf16> to vector<3x8x256xbf16>
    %18 = tpu.concatenate %16, %17 in 0 : vector<1x8x256xbf16>, vector<3x8x256xbf16> -> vector<4x8x256xbf16>
    %19 = vector.shape_cast %18 : vector<4x8x256xbf16> to vector<32x256xbf16>
    %c0_9 = arith.constant 0 : index
    %c0_10 = arith.constant 0 : index
    %c0_11 = arith.constant 0 : index
    %20 = vector.load %arg4[%c0_9, %c0_10, %c0_11] : memref<3x256x256xbf16, #tpu.memory_space<vmem>>, vector<1x256x256xbf16>
    %21 = vector.shape_cast %20 : vector<1x256x256xbf16> to vector<256x256xbf16>
    %cst_12 = arith.constant dense<0.000000e+00> : vector<32x256xf32>
    %22 = tpu.matmul %19, %21, %cst_12 {dimension_numbers = #tpu.dot_dimension_numbers<[1], [0], [0], [1], [0, 0, 1, 1], [], []>} : vector<32x256xbf16>, vector<256x256xbf16>, vector<32x256xf32> -> vector<32x256xf32>
    %23 = vector.shape_cast %13 : vector<4x8x256xbf16> to vector<32x256xbf16>
    %c1 = arith.constant 1 : index
    %c0_13 = arith.constant 0 : index
    %c0_14 = arith.constant 0 : index
    %24 = vector.load %arg4[%c1, %c0_13, %c0_14] : memref<3x256x256xbf16, #tpu.memory_space<vmem>>, vector<1x256x256xbf16>
    %25 = vector.shape_cast %24 : vector<1x256x256xbf16> to vector<256x256xbf16>
    %cst_15 = arith.constant dense<0.000000e+00> : vector<32x256xf32>
    %26 = tpu.matmul %23, %25, %cst_15 {dimension_numbers = #tpu.dot_dimension_numbers<[1], [0], [0], [1], [0, 0, 1, 1], [], []>} : vector<32x256xbf16>, vector<256x256xbf16>, vector<32x256xf32> -> vector<32x256xf32>
    %27 = arith.addf %22, %26 : vector<32x256xf32>
    %28 = vector.shape_cast %15 : vector<4x8x256xbf16> to vector<32x256xbf16>
    %c2 = arith.constant 2 : index
    %c0_16 = arith.constant 0 : index
    %c0_17 = arith.constant 0 : index
    %29 = vector.load %arg4[%c2, %c0_16, %c0_17] : memref<3x256x256xbf16, #tpu.memory_space<vmem>>, vector<1x256x256xbf16>
    %30 = vector.shape_cast %29 : vector<1x256x256xbf16> to vector<256x256xbf16>
    %cst_18 = arith.constant dense<0.000000e+00> : vector<32x256xf32>
    %31 = tpu.matmul %28, %30, %cst_18 {dimension_numbers = #tpu.dot_dimension_numbers<[1], [0], [0], [1], [0, 0, 1, 1], [], []>} : vector<32x256xbf16>, vector<256x256xbf16>, vector<32x256xf32> -> vector<32x256xf32>
    %32 = arith.addf %27, %31 : vector<32x256xf32>
    %c0_19 = arith.constant 0 : index
    %c0_20 = arith.constant 0 : index
    %33 = vector.load %arg5[%c0_19, %c0_20] : memref<1x256xf32, #tpu.memory_space<vmem>>, vector<1x256xf32>
    %34 = vector.broadcast %33 : vector<1x256xf32> to vector<32x256xf32>
    %35 = arith.addf %32, %34 : vector<32x256xf32>
    %cst_21 = arith.constant 0.000000e+00 : f32
    %36 = vector.broadcast %cst_21 : f32 to vector<32x256xf32>
    %37 = arith.maximumf %35, %36 : vector<32x256xf32>
    %38 = arith.truncf %37 : vector<32x256xf32> to vector<32x256xbf16>
    %39 = vector.shape_cast %38 : vector<32x256xbf16> to vector<2x2x8x256xbf16>
    %40 = vector.extract_strided_slice %39 {offsets = [0, 0, 0, 0], sizes = [2, 1, 8, 256], strides = [1, 1, 1, 1]} : vector<2x2x8x256xbf16> to vector<2x1x8x256xbf16>
    %41 = vector.shape_cast %40 : vector<2x1x8x256xbf16> to vector<2x8x256xbf16>
    %42 = vector.extract_strided_slice %39 {offsets = [0, 1, 0, 0], sizes = [2, 1, 8, 256], strides = [1, 1, 1, 1]} : vector<2x2x8x256xbf16> to vector<2x1x8x256xbf16>
    %43 = vector.shape_cast %42 : vector<2x1x8x256xbf16> to vector<2x8x256xbf16>
    %cst_22 = arith.constant 0.000000e+00 : bf16
    %44 = vector.broadcast %cst_22 : bf16 to vector<1x8x256xbf16>
    %45 = vector.extract_strided_slice %43 {offsets = [0, 0, 0], sizes = [1, 8, 256], strides = [1, 1, 1]} : vector<2x8x256xbf16> to vector<1x8x256xbf16>
    %46 = tpu.concatenate %44, %45 in 0 : vector<1x8x256xbf16>, vector<1x8x256xbf16> -> vector<2x8x256xbf16>
    %47 = vector.shape_cast %46 : vector<2x8x256xbf16> to vector<16x256xbf16>
    %c0_23 = arith.constant 0 : index
    %c0_24 = arith.constant 0 : index
    %c0_25 = arith.constant 0 : index
    %48 = vector.load %arg6[%c0_23, %c0_24, %c0_25] : memref<3x256x256xbf16, #tpu.memory_space<vmem>>, vector<1x256x256xbf16>
    %49 = vector.shape_cast %48 : vector<1x256x256xbf16> to vector<256x256xbf16>
    %cst_26 = arith.constant dense<0.000000e+00> : vector<16x256xf32>
    %50 = tpu.matmul %47, %49, %cst_26 {dimension_numbers = #tpu.dot_dimension_numbers<[1], [0], [0], [1], [0, 0, 1, 1], [], []>} : vector<16x256xbf16>, vector<256x256xbf16>, vector<16x256xf32> -> vector<16x256xf32>
    %51 = vector.shape_cast %41 : vector<2x8x256xbf16> to vector<16x256xbf16>
    %c1_27 = arith.constant 1 : index
    %c0_28 = arith.constant 0 : index
    %c0_29 = arith.constant 0 : index
    %52 = vector.load %arg6[%c1_27, %c0_28, %c0_29] : memref<3x256x256xbf16, #tpu.memory_space<vmem>>, vector<1x256x256xbf16>
    %53 = vector.shape_cast %52 : vector<1x256x256xbf16> to vector<256x256xbf16>
    %cst_30 = arith.constant dense<0.000000e+00> : vector<16x256xf32>
    %54 = tpu.matmul %51, %53, %cst_30 {dimension_numbers = #tpu.dot_dimension_numbers<[1], [0], [0], [1], [0, 0, 1, 1], [], []>} : vector<16x256xbf16>, vector<256x256xbf16>, vector<16x256xf32> -> vector<16x256xf32>
    %55 = arith.addf %50, %54 : vector<16x256xf32>
    %56 = vector.shape_cast %43 : vector<2x8x256xbf16> to vector<16x256xbf16>
    %c2_31 = arith.constant 2 : index
    %c0_32 = arith.constant 0 : index
    %c0_33 = arith.constant 0 : index
    %57 = vector.load %arg6[%c2_31, %c0_32, %c0_33] : memref<3x256x256xbf16, #tpu.memory_space<vmem>>, vector<1x256x256xbf16>
    %58 = vector.shape_cast %57 : vector<1x256x256xbf16> to vector<256x256xbf16>
    %cst_34 = arith.constant dense<0.000000e+00> : vector<16x256xf32>
    %59 = tpu.matmul %56, %58, %cst_34 {dimension_numbers = #tpu.dot_dimension_numbers<[1], [0], [0], [1], [0, 0, 1, 1], [], []>} : vector<16x256xbf16>, vector<256x256xbf16>, vector<16x256xf32> -> vector<16x256xf32>
    %60 = arith.addf %55, %59 : vector<16x256xf32>
    %c0_35 = arith.constant 0 : index
    %c0_36 = arith.constant 0 : index
    %61 = vector.load %arg7[%c0_35, %c0_36] : memref<1x256xf32, #tpu.memory_space<vmem>>, vector<1x256xf32>
    %62 = vector.broadcast %61 : vector<1x256xf32> to vector<16x256xf32>
    %63 = arith.addf %60, %62 : vector<16x256xf32>
    %cst_37 = arith.constant 0.000000e+00 : f32
    %64 = vector.broadcast %cst_37 : f32 to vector<16x256xf32>
    %65 = arith.maximumf %63, %64 : vector<16x256xf32>
    %66 = arith.truncf %65 : vector<16x256xf32> to vector<16x256xbf16>
    %67 = vector.shape_cast %66 : vector<16x256xbf16> to vector<2x8x256xbf16>
    %68 = arith.extf %67 : vector<2x8x256xbf16> to vector<2x8x256xf32>
    %cst_38 = arith.constant dense<0.000000e+00> : vector<8x256xf32>
    %69 = vector.multi_reduction <add>, %68, %cst_38 [0] : vector<2x8x256xf32> to vector<8x256xf32>
    %cst_39 = arith.constant 2.000000e+00 : f32
    %70 = vector.broadcast %cst_39 : f32 to vector<8x256xf32>
    %71 = arith.divf %69, %70 : vector<8x256xf32>
    %72 = arith.truncf %71 : vector<8x256xf32> to vector<8x256xbf16>
    %c0_40 = arith.constant 0 : index
    %c0_41 = arith.constant 0 : index
    %73 = vector.load %arg8[%c0_40, %c0_41] : memref<256x128xbf16, #tpu.memory_space<vmem>>, vector<256x128xbf16>
    %cst_42 = arith.constant dense<0.000000e+00> : vector<8x128xf32>
    %74 = tpu.matmul %72, %73, %cst_42 {dimension_numbers = #tpu.dot_dimension_numbers<[1], [0], [0], [1], [0, 0, 1, 1], [], []>} : vector<8x256xbf16>, vector<256x128xbf16>, vector<8x128xf32> -> vector<8x128xf32>
    %c0_43 = arith.constant 0 : index
    %c0_44 = arith.constant 0 : index
    %75 = vector.load %arg9[%c0_43, %c0_44] : memref<1x128xf32, #tpu.memory_space<vmem>>, vector<1x128xf32>
    %76 = vector.broadcast %75 : vector<1x128xf32> to vector<8x128xf32>
    %77 = arith.addf %74, %76 : vector<8x128xf32>
    %cst_45 = arith.constant 0.000000e+00 : f32
    %78 = vector.broadcast %cst_45 : f32 to vector<8x128xf32>
    %79 = arith.maximumf %77, %78 : vector<8x128xf32>
    %c0_46 = arith.constant 0 : index
    %c0_47 = arith.constant 0 : index
    %80 = vector.load %arg10[%c0_46, %c0_47] : memref<1x128xf32, #tpu.memory_space<vmem>>, vector<1x128xf32>
    %81 = vector.broadcast %80 : vector<1x128xf32> to vector<8x128xf32>
    %82 = arith.mulf %79, %81 : vector<8x128xf32>
    %cst_48 = arith.constant dense<0.000000e+00> : vector<8xf32>
    %83 = vector.multi_reduction <add>, %82, %cst_48 [1] : vector<8x128xf32> to vector<8xf32>
    %84 = vector.shape_cast %83 : vector<8xf32> to vector<1x8xf32>
    %c0_49 = arith.constant 0 : index
    %c0_50 = arith.constant 0 : index
    %85 = vector.load %arg11[%c0_49, %c0_50] : memref<1x1xf32, #tpu.memory_space<vmem>>, vector<1x1xf32>
    %86 = vector.broadcast %85 : vector<1x1xf32> to vector<1x8xf32>
    %87 = arith.addf %84, %86 : vector<1x8xf32>
    %c0_51 = arith.constant 0 : index
    %c0_52 = arith.constant 0 : index
    %c0_53 = arith.constant 0 : index
    %88 = vector.load %arg12[%c0_51, %c0_52, %c0_53] : memref<1x1x8xf32, #tpu.memory_space<vmem>>, vector<1x1x8xf32>
    %89 = vector.shape_cast %88 : vector<1x1x8xf32> to vector<1x8xf32>
    %90 = vector.shape_cast %87 : vector<1x8xf32> to vector<1x1x8xf32>
    tpu.vector_store %arg12[%c0_51, %c0_52, %c0_53], %90 {strides = array<i32>} : memref<1x1x8xf32, #tpu.memory_space<vmem>>, vector<1x1x8xf32>,
    return
  }
  func.func @transform_0(%arg0: i32) -> (i32, i32, i32, i32) {
    %c0_i32 = arith.constant 0 : i32
    %c0_i32_0 = arith.constant 0 : i32
    %c0_i32_1 = arith.constant 0 : i32
    %c0_i32_2 = arith.constant 0 : i32
    return %arg0, %c0_i32, %c0_i32_0, %c0_i32_1 : i32, i32, i32, i32
  }
  func.func @transform_1(%arg0: i32) -> (i32, i32) {
    %c0_i32 = arith.constant 0 : i32
    %c0_i32_0 = arith.constant 0 : i32
    %c0_i32_1 = arith.constant 0 : i32
    return %c0_i32, %c0_i32_0 : i32, i32
  }
  func.func @transform_2(%arg0: i32) -> (i32, i32) {
    %c0_i32 = arith.constant 0 : i32
    %c0_i32_0 = arith.constant 0 : i32
    %c0_i32_1 = arith.constant 0 : i32
    return %c0_i32, %c0_i32_0 : i32, i32
  }
  func.func @transform_3(%arg0: i32) -> (i32, i32, i32) {
    %c0_i32 = arith.constant 0 : i32
    %c0_i32_0 = arith.constant 0 : i32
    %c0_i32_1 = arith.constant 0 : i32
    %c0_i32_2 = arith.constant 0 : i32
    return %c0_i32, %c0_i32_0, %c0_i32_1 : i32, i32, i32
  }
  func.func @transform_4(%arg0: i32) -> (i32, i32) {
    %c0_i32 = arith.constant 0 : i32
    %c0_i32_0 = arith.constant 0 : i32
    %c0_i32_1 = arith.constant 0 : i32
    return %c0_i32, %c0_i32_0 : i32, i32
  }
  func.func @transform_5(%arg0: i32) -> (i32, i32, i32) {
    %c0_i32 = arith.constant 0 : i32
    %c0_i32_0 = arith.constant 0 : i32
    %c0_i32_1 = arith.constant 0 : i32
    %c0_i32_2 = arith.constant 0 : i32
    return %c0_i32, %c0_i32_0, %c0_i32_1 : i32, i32, i32
  }
  func.func @transform_6(%arg0: i32) -> (i32, i32) {
    %c0_i32 = arith.constant 0 : i32
    %c0_i32_0 = arith.constant 0 : i32
    %c0_i32_1 = arith.constant 0 : i32
    return %c0_i32, %c0_i32_0 : i32, i32
  }
  func.func @transform_7(%arg0: i32) -> (i32, i32) {
    %c0_i32 = arith.constant 0 : i32
    %c0_i32_0 = arith.constant 0 : i32
    %c0_i32_1 = arith.constant 0 : i32
    return %c0_i32, %c0_i32_0 : i32, i32
  }
  func.func @transform_8(%arg0: i32) -> (i32, i32) {
    %c0_i32 = arith.constant 0 : i32
    %c0_i32_0 = arith.constant 0 : i32
    %c0_i32_1 = arith.constant 0 : i32
    return %c0_i32, %c0_i32_0 : i32, i32
  }
  func.func @transform_9(%arg0: i32) -> (i32, i32) {
    %c0_i32 = arith.constant 0 : i32
    %c0_i32_0 = arith.constant 0 : i32
    %c0_i32_1 = arith.constant 0 : i32
    return %c0_i32, %c0_i32_0 : i32, i32
  }
  func.func @transform_10(%arg0: i32) -> (i32, i32) {
    %c0_i32 = arith.constant 0 : i32
    %c0_i32_0 = arith.constant 0 : i32
    %c0_i32_1 = arith.constant 0 : i32
    return %c0_i32, %c0_i32_0 : i32, i32
  }
  func.func @transform_11(%arg0: i32) -> (i32, i32, i32) {
    %c0_i32 = arith.constant 0 : i32
    %c0_i32_0 = arith.constant 0 : i32
    %c0_i32_1 = arith.constant 0 : i32
    return %arg0, %c0_i32, %c0_i32_0 : i32, i32, i32
  }
}

</mosaic_0001>

<bundles_post_ra>
// kernel: tpu_custom_call.1
= control target key start
LH: loop header
LB: loop body
LE: loop exit
PB: predicated region body
PF: predicated region fallthrough
CT: control target
= control target key end

     0   :  { %s4496_s0 = inlined_call_operand.hbm [shape: bf16[2,8,8,8], index: 0, kind: input, shape index: {}]   ;;  %s4497_s1 = inlined_call_operand.hbm [shape: bf16[8,256], index: 1, kind: input, shape index: {}]   ;;  %s4498_s2 = inlined_call_operand.vmem [shape: f32[1,256], index: 2, kind: input, shape index: {}]   ;;  %s4499_s3 = inlined_call_operand.hbm [shape: bf16[3,256,256], index: 3, kind: input, shape index: {}]   ;;  %s4500_s4 = inlined_call_operand.vmem [shape: f32[1,256], index: 4, kind: input, shape index: {}]   ;;  %s4501_s5 = inlined_call_operand.hbm [shape: bf16[3,256,256], index: 5, kind: input, shape index: {}]   ;;  %s4502_s6 = inlined_call_operand.vmem [shape: f32[1,256], index: 6, kind: input, shape index: {}]   ;;  %s4503_s7 = inlined_call_operand.hbm [shape: bf16[256,128], index: 7, kind: input, shape index: {}]   ;;  %s4504_s8 = inlined_call_operand.vmem [shape: f32[1,128], index: 8, kind: input, shape index: {}]   ;;  %s4505_s9 = inlined_call_operand.vmem [shape: f32[1,128], index: 9, kind: input, shape index: {}]   ;;  %s4506_s10 = inlined_call_operand.<no memory space> [shape: f32[1,1], index: 10, kind: input, shape index: {}]   ;;  %s4507_s11 = inlined_call_operand.hbm [shape: f32[2,1,8], index: 11, kind: output, shape index: {}]  }
   0x1   :  { %4510 = sst [smem:[#allocation17_spill]] %s4497_s1  ;;  %v16_v0 = vstv %s4506_s10 }
   0x2   :  { %4511 = sst [smem:[#allocation18_spill]] %s4499_s3  ;;  %17 = vst [vmem:[#allocation2] sm:$0x1] %v16_v0 }
   0x3   :  { %4512 = sst [smem:[#allocation19_spill]] %s4501_s5 }
   0x4   :  { %4513 = sst [smem:[#allocation20_spill]] %s4503_s7 }
   0x5   :  { %18 = vsyncpa [#allocation4], 0 }
   0x6   :  { %20 = vsyncpa [#allocation4 + $0x1], 0 }
   0x7   :  { %21 = vsyncpa [#allocation7], 0 }
   0x8   :  { %22 = vsyncpa [#allocation10], 0 }
   0x9   :  { %23 = vsyncpa [#allocation5], 0 }
   0xa   :  { %25 = vsyncpa [#allocation5 + $0x1], 0  ;;  %s4094_s19 = smov 0   ;;  %s4096_s20 = smov 0  }
   0xb   :  { %s4098_s21 = smov 0   ;;  %s4100_s22 = smov 0  }
   0xc LB: > { %s4115_s10 = sadd.s32 4294967295, %s4019_s22   ;;  %s2610_s23 = sadd.s32 4294967294, %s4019_s22   ;;  %s4019_s22 = sphi %s4100_s22, %s4530_s22   ;;  %s4015_s21 = sphi %s4098_s21, %s4529_s21   ;;  %s4011_s20 = sphi %s4096_s20, %s4528_s20   ;;  %s4007_s19 = sphi %s4094_s19, %s4527_s19  }
   0xd   : > { %p51_p0 = scmp.ne.s32.totalorder %s4011_s20, %s4007_s19  ;;  %p52_p1 = scmp.eq.s32.totalorder %s4115_s10, 0 }
   0xe   : > { %p285_p2 = scmp.eq.s32.totalorder %s4115_s10, 1  ;;  %p291_p3 = scmp.eq.s32.totalorder %s2610_s23, 1 }
   0xf   : > { %p4124_p4 = por %p52_p1, %p51_p0  ;;  %p2611_p5 = scmp.ge.s32.totalorder %s4019_s22, 1 }
  0x10   : > { %p4129_p6 = por %p291_p3, %p51_p0  ;;  %p298_p7 = scmp.lt.s32.totalorder %s4019_s22, 3 }
  0x11   : > { %s4516_s1 = sld [smem:[#allocation17_spill]]  ;;  %s4021_s30 = smov [#allocation6]  }
  0x12   : > { %p4137_p8 = pnand %p2611_p5, %p298_p7  ;;  %s312_s12 = sshll.u32 %s4021_s30, 4  ;;  %s313_s12 = int_to_ptr.vmem [resolvable:$true] %s312_s12 }
  0x13   : > { %s4519_s5 = sld [smem:[#allocation19_spill]]  ;;  %s4022_s17 = smov [#allocation9]  }
  0x14   : > { %p3717_p10 = pneg %p4137_p8  ;;  %s343_s18 = sshll.u32 %s4022_s17, 4  ;;  %s344_s18 = int_to_ptr.vmem [resolvable:$true] %s343_s18 }
  0x15   : > { %s4520_s3 = sld [smem:[#allocation18_spill]]  ;;  %s4023_s30 = smov 128  }
  0x16   : > { %p4146_p11 = pnand %p3717_p10, %p52_p1  ;;  %s4024_s14 = smov 8  }
  0x17   : > { %s310_s28 = sshll.u32 %s4516_s1, 4  ;;  %s4521_s7 = sld [smem:[#allocation20_spill]]  ;;  %s311_s28 = int_to_ptr.hbm [resolvable:$true] %s310_s28 }
  0x18   : > { %3720 = dma.hbm_to_vmem [thread:$0]  (!%p4146_p11), %s311_s28, 128, %s313_s12, [#allocation7]  }
  0x19   : > { %s341_s16 = sshll.u32 %s4519_s5, 4  ;;  %s4025_s12 = smov [#allocation8]   ;;  %s342_s16 = int_to_ptr.hbm [resolvable:$true] %s341_s16 }
  0x1a   : > { %3726 = dma.hbm_to_vmem [thread:$0]  (!%p4146_p11), %s342_s16, 12288, %s344_s18, [#allocation10], %s4023_s30, %s4023_s30, %s4024_s14  }
  0x1b   : > { %s324_s27 = sshll.u32 %s4520_s3, 4  ;;  %s326_s17 = sshll.u32 %s4025_s12, 4  ;;  %s325_s27 = int_to_ptr.hbm [resolvable:$true] %s324_s27  ;;  %s327_s17 = int_to_ptr.vmem [resolvable:$true] %s326_s17 }
  0x1c   : > { %3723 = dma.hbm_to_vmem [thread:$0]  (!%p4146_p11), %s325_s27, 12288, %s327_s17, [#allocation7], %s4023_s30, %s4023_s30, %s4024_s14  }
  0x1d   : > { %s358_s28 = sshll.u32 %s4521_s7, 4  ;;  %s4026_s23 = smov [#allocation11]   ;;  %s359_s28 = int_to_ptr.hbm [resolvable:$true] %s358_s28 }
  0x1e   : > { %s360_s16 = sshll.u32 %s4026_s23, 4  ;;  %s4508_s1 = smov 64   ;;  %s361_s16 = int_to_ptr.vmem [resolvable:$true] %s360_s16 }
  0x1f   : > { %s4509_s18 = smov 4   ;;  %s4171_s26 = sadd.s32 1, %s4019_s22  }
  0x20   : > { %3729 = dma.hbm_to_vmem [thread:$0]  (!%p4146_p11), %s359_s28, 2048, %s361_s16, [#allocation10], %s4508_s1, %s4508_s1, %s4509_s18  }
  0x21   : > { %s35_s15 = ssub.s32 %s4019_s22, %s4171_s26  ;;  %s38_s12 = sadd.s32 1, %s4015_s21 }
  0x22   : > { %p36_p12 = scmp.eq.s32.totalorder %s35_s15, 0  ;;  %p45_p13 = scmp.ne.s32.totalorder %s4015_s21, %s4011_s20 }
  0x23   : > { %p46_p0 = scmp.eq.s32.totalorder %s4019_s22, 0  ;;  %p3742_p7 = scmp.lt.s32.totalorder %s4019_s22, 2 }
  0x24   : > { %s4180_s27 = scalar_select %p36_p12, %s4015_s21, %s38_s12  }
  0x25   : > { %p47_p3 = por %p46_p0, %p45_p13  ;;  %p4184_p5 = por %p285_p2, %p45_p13 }
  0x26   : > { %s383_s13 = sand.u32 1, %s4015_s21   ;;  %s3484_s28 = sshll.u32 %s4019_s22, 5 }
  0x27   : > { %s2617_s14 = sshll.u32 %s383_s13, 5  ;;  %s392_s16 = scalar_lea.hbm %s4496_s0, %s3484_s28 }
  0x28   : > { %s387_s15 = scalar_lea.vmem [#allocation3], %s2617_s14  ;;  %s393_s18 = sshll.u32 %s392_s16, 4  ;;  %s394_s18 = int_to_ptr.hbm [resolvable:$true] %s393_s18 }
  0x29   : > { %s395_s1 = sshll.u32 %s387_s15, 4  ;;  %p4194_p10 = pnand %p3742_p7, %p47_p3  ;;  %s396_s1 = int_to_ptr.vmem [resolvable:$true] %s395_s1 }
  0x2a   : > { %s384_s3 = scalar_lea.sflag [#allocation4], %s383_s13  ;;  %s3915_s5 = sshra.s32 %s394_s18, 4  ;;  %s3916_s5 = int_to_ptr.hbm [resolvable:$true] %s3915_s5 }
  0x2b   : > { %s3917_s7 = scalar_lea.hbm %s3916_s5, 32  ;;  %p3919_p11 = pneg %p4194_p10 }
  0x2c   : > { %p3918_p2 = scmp.ne.s32.totalorder %s3916_s5, %s3917_s7  ;;  %s3922_s17 = scalar_lea.hbm %s4496_s0, 64 }
  0x2d   : > { %p3923_p0 = scmp.lt.s32.totalorder %s3916_s5, %s4496_s0  ;;  %p3924_p3 = scmp.lt.s32.totalorder %s3922_s17, %s3917_s7 }
  0x2e   : > { %p3920_p12 = pnand %p3919_p11, %p3918_p2 }
  0x2f   : > { %p3925_p7 = por %p3924_p3, %p3923_p0 }
  0x30   : > { %p3921_p13 = pneg %p3920_p12 }
  0x32   : > { %p3926_p9 = pnand %p3925_p7, %p3921_p13 }
  0x34   : > { %3929 = shalt.err (!%p3926_p9)
}
  0x35   : > { %s4524_s13 = smov 4   ;;  %s4525_s15 = smov 64  }
  0x36   : > { %3733 = dma.hbm_to_vmem [thread:$0]  (!%p4194_p10), %s394_s18, 512, %s396_s1, %s384_s3, %s4525_s15, %s4525_s15, %s4524_s13  }
  0x37   : > { %407 = sbr.rel (%p4137_p8) target bundleno = 949 (0x3b5), region = 64  ;;  %s4214_s28 = sand.u32 (!%p4137_p8), 1, %s4011_s20  }
  0x38   : > { %s2621_s5 = sshll.u32 (!%p4137_p8), %s4214_s28, 5  ;;  %s410_s7 = scalar_lea.sflag (!%p4137_p8), [#allocation4], %s4214_s28 }
  0x39   : > { %s4218_s14 = scalar_lea.vmem (!%p4137_p8), [#allocation3], %s2621_s5 }
  0x3c   : > { %3990 = dma.done.wait (%p4124_p4), %s410_s7, 512  }
  0x3d   : > { %3992 = vsyncadd (%p4124_p4), %s410_s7, 4294966784 }
  0x3e   : > { %3994 = dma.done.wait (%p52_p1), [#allocation7], 12416  }
  0x3f   : > { %3996 = vsyncadd (%p52_p1), [#allocation7], 4294954880 }
  0x40   : > { %3998 = dma.done.wait (%p52_p1), [#allocation10], 14336  }
  0x41   : > { %4000 = vsyncadd (%p52_p1), [#allocation10], 4294952960  ;;  %v481_v1 = vld [vmem:[#allocation6] sm:$0xff]  ;;  %vm526_vm0 = vcmask 1043456   ;;  %vm513_vm1 = vcmask 64512   ;;  %v3486_v9 = vld [vmem:[%s4218_s14 + $0x8] sm:$0xff]  ;;  %s2502_s7 = scalar_lea.hbm %s4507_s11, %s4115_s10 }
  0x42   : > { %v509_v2 = vunpack.c.l.b16 %v481_v1  ;;  %v510_v3 = vunpack.c.h.b16 %v481_v1  ;;  %v3485_v8 = vld [vmem:[%s4218_s14] sm:$0xff]  ;;  %v2836_v10 = vld [vmem:[#allocation8 + $0x70] sm:$0xf]  ;;  %v2828_v15 = vld [vmem:[#allocation8 + $0x60] sm:$0xf]  ;;  %s2506_s24 = sshll.u32 %s2502_s7, 4  ;;  %s2507_s24 = int_to_ptr.hbm [resolvable:$true] %s2506_s24 }
  0x43   : > { %v3504_v11 = vld [vmem:[#allocation8 + $0x74] sm:$0xf0]  ;;  %v2900_v12 = vld [vmem:[#allocation8 + $0xf0] sm:$0xf]  ;;  %v3502_v16 = vld [vmem:[#allocation8 + $0x64] sm:$0xf0] }
  0x44   : > { %v511_v4 = vpack.c.b16 %v509_v2, %v509_v2  ;;  %v512_v5 = vpack.c.b16 %v510_v3, %v510_v3  ;;  %v2837_v13 = vor.u32 %v3504_v11, %v2836_v10  ;;  %v3520_v14 = vld [vmem:[#allocation8 + $0xf4] sm:$0xf0]  ;;  %v2892_v18 = vld [vmem:[#allocation8 + $0xe0] sm:$0xf]  ;;  %v3518_v19 = vld [vmem:[#allocation8 + $0xe4] sm:$0xf0]  ;;  %v2829_v21 = vor.u32 %v3502_v16, %v2828_v15 }
  0x45   : > { %v2901_v17 = vor.u32 %v3520_v14, %v2900_v12  ;;  %v2708_v20 = vld [vmem:[#allocation8 + $0x170] sm:$0xf]  ;;  %v3536_v22 = vld [vmem:[#allocation8 + $0x174] sm:$0xf0]  ;;  %v2893_v25 = vor.u32 %v3518_v19, %v2892_v18  ;;  %v3487_v34 = vld [vmem:[%s4218_s14 + $0x10] sm:$0xff]  ;;  %vm2491_vm3 = vcmask 57344  }
  0x46   : > { %v528_v6 = vsel %vm526_vm0, %v511_v4, 0  ;;  %v531_v7 = vsel %vm526_vm0, %v512_v5, 0  ;;  %v2772_v23 = vld [vmem:[#allocation8 + $0x1f0] sm:$0xf]  ;;  %v3552_v24 = vld [vmem:[#allocation8 + $0x1f4] sm:$0xf0]  ;;  %v2709_v26 = vor.u32 %v3536_v22, %v2708_v20 }
  0x47   : > { %540 = vmatpush.bf16.msra.mxu0 %v528_v6  ;;  %569 = vmatpush.bf16.msra.mxu1 %v531_v7  ;;  %v2773_v27 = vor.u32 %v3552_v24, %v2772_v23  ;;  %v2820_v28 = vld [vmem:[#allocation8 + $0x50] sm:$0xf]  ;;  %v3500_v29 = vld [vmem:[#allocation8 + $0x54] sm:$0xf0]  ;;  %v2700_v36 = vld [vmem:[#allocation8 + $0x160] sm:$0xf] }
  0x48   : > { %v2884_v30 = vld [vmem:[#allocation8 + $0xd0] sm:$0xf]  ;;  %v3516_v31 = vld [vmem:[#allocation8 + $0xd4] sm:$0xf0]  ;;  %871 = vmatpush.bf16.msra.mxu2 %v2709_v26  ;;  %v2821_v32 = vor.u32 %v3500_v29, %v2820_v28  ;;  %v3534_v37 = vld [vmem:[#allocation8 + $0x164] sm:$0xf0] }
  0x49   : > { %890 = vmatpush.bf16.msra.mxu3 %v2773_v27  ;;  %v2885_v33 = vor.u32 %v3516_v31, %v2884_v30  ;;  %v3488_v35 = vld [vmem:[%s4218_s14 + $0x18] sm:$0xff]  ;;  %v2764_v38 = vld [vmem:[#allocation8 + $0x1e0] sm:$0xf]  ;;  %v2701_v39 = vor.u32 %v3534_v37, %v2700_v36  ;;  %v3550_v40 = vld [vmem:[#allocation8 + $0x1e4] sm:$0xf0]  ;;  %s471_s14 = scalar_lea.vmem [#allocation12], %s4214_s28 }
  0x4a   : > { %2642 = vmatmul.msk.bf16.vlgmr.msra.gmra.mxu0 %vm513_vm1, %v3485_v8  ;;  %2646 = vmatmul.msk.bf16.vlgmr.msra.gmra.mxu1 %vm513_vm1, %v3485_v8  ;;  %v2812_v41 = vld [vmem:[#allocation8 + $0x40] sm:$0xf]  ;;  %v3498_v42 = vld [vmem:[#allocation8 + $0x44] sm:$0xf0]  ;;  %v2765_v43 = vor.u32 %v3550_v40, %v2764_v38  ;;  %v2692_v48 = vld [vmem:[#allocation8 + $0x150] sm:$0xf] }
  0x4b   : > { %1115 = vmatpush.bf16.msrb.mxu0 %v2837_v13  ;;  %1134 = vmatpush.bf16.msrb.mxu1 %v2901_v17  ;;  %v2813_v44 = vor.u32 %v3498_v42, %v2812_v41  ;;  %v2876_v45 = vld [vmem:[#allocation8 + $0xc0] sm:$0xf]  ;;  %v3514_v46 = vld [vmem:[#allocation8 + $0xc4] sm:$0xf0]  ;;  %v3532_v49 = vld [vmem:[#allocation8 + $0x154] sm:$0xf0] }
  0x4c   : > { %872 = vmatpush.bf16.msra.mxu2 %v2701_v39  ;;  %v2877_v47 = vor.u32 %v3514_v46, %v2876_v45  ;;  %v2756_v50 = vld [vmem:[#allocation8 + $0x1d0] sm:$0xf]  ;;  %v2693_v51 = vor.u32 %v3532_v49, %v2692_v48  ;;  %v3548_v52 = vld [vmem:[#allocation8 + $0x1d4] sm:$0xf0]  ;;  %v2684_v60 = vld [vmem:[#allocation8 + $0x140] sm:$0xf] }
  0x4d   : > { %891 = vmatpush.bf16.msra.mxu3 %v2765_v43  ;;  %v2804_v53 = vld [vmem:[#allocation8 + $0x30] sm:$0xf]  ;;  %v3496_v54 = vld [vmem:[#allocation8 + $0x34] sm:$0xf0]  ;;  %v2757_v55 = vor.u32 %v3548_v52, %v2756_v50  ;;  %v3530_v61 = vld [vmem:[#allocation8 + $0x144] sm:$0xf0] }
  0x4e   : > { %v2805_v56 = vor.u32 %v3496_v54, %v2804_v53  ;;  %v2868_v57 = vld [vmem:[#allocation8 + $0xb0] sm:$0xf]  ;;  %v3512_v58 = vld [vmem:[#allocation8 + $0xb4] sm:$0xf0]  ;;  %v2748_v62 = vld [vmem:[#allocation8 + $0x1c0] sm:$0xf]  ;;  %v2685_v63 = vor.u32 %v3530_v61, %v2684_v60 }
  0x4f   : > { %1116 = vmatpush.bf16.msrb.mxu0 %v2829_v21  ;;  %1135 = vmatpush.bf16.msrb.mxu1 %v2893_v25  ;;  %v2869_v59 = vor.u32 %v3512_v58, %v2868_v57  ;;  %v3546_v0 = vld [vmem:[#allocation8 + $0x1c4] sm:$0xf0]  ;;  %v2796_v1 = vld [vmem:[#allocation8 + $0x20] sm:$0xf]  ;;  %v2676_v8 = vld [vmem:[#allocation8 + $0x130] sm:$0xf] }
  0x50   : > { %873 = vmatpush.bf16.msra.mxu2 %v2693_v51  ;;  %v3494_v2 = vld [vmem:[#allocation8 + $0x24] sm:$0xf0]  ;;  %v2749_v3 = vor.u32 %v3546_v0, %v2748_v62  ;;  %v2860_v5 = vld [vmem:[#allocation8 + $0xa0] sm:$0xf]  ;;  %v2740_v10 = vld [vmem:[#allocation8 + $0x1b0] sm:$0xf] }
  0x51   : > { %892 = vmatpush.bf16.msra.mxu3 %v2757_v55  ;;  %v2797_v4 = vor.u32 %v3494_v2, %v2796_v1  ;;  %v3510_v6 = vld [vmem:[#allocation8 + $0xa4] sm:$0xf0]  ;;  %v3544_v12 = vld [vmem:[#allocation8 + $0x1b4] sm:$0xf0]  ;;  %v2788_v13 = vld [vmem:[#allocation8 + $0x10] sm:$0xf] }
  0x52   : > { %v2861_v7 = vor.u32 %v3510_v6, %v2860_v5  ;;  %v3492_v14 = vld [vmem:[#allocation8 + $0x14] sm:$0xf0]  ;;  %v2741_v15 = vor.u32 %v3544_v12, %v2740_v10  ;;  %v2852_v17 = vld [vmem:[#allocation8 + $0x90] sm:$0xf]  ;;  %v2668_v20 = vld [vmem:[#allocation8 + $0x120] sm:$0xf] }
  0x53   : > { %1117 = vmatpush.bf16.msrb.mxu0 %v2821_v32  ;;  %1136 = vmatpush.bf16.msrb.mxu1 %v2885_v33  ;;  %v2789_v16 = vor.u32 %v3492_v14, %v2788_v13  ;;  %v3508_v18 = vld [vmem:[#allocation8 + $0x94] sm:$0xf0]  ;;  %v3526_v21 = vld [vmem:[#allocation8 + $0x124] sm:$0xf0]  ;;  %v2732_v22 = vld [vmem:[#allocation8 + $0x1a0] sm:$0xf] }
  0x54   : > { %874 = vmatpush.bf16.msra.mxu2 %v2685_v63  ;;  %v2853_v19 = vor.u32 %v3508_v18, %v2852_v17  ;;  %v2669_v23 = vor.u32 %v3526_v21, %v2668_v20  ;;  %v3542_v24 = vld [vmem:[#allocation8 + $0x1a4] sm:$0xf0]  ;;  %v2780_v25 = vld [vmem:[#allocation8] sm:$0xf]  ;;  %v4029_v32 = vmov 0   ;;  %s2504_s3 = sshll.u32 %s471_s14, 4  ;;  %s2505_s3 = int_to_ptr.vmem [resolvable:$true] %s2504_s3 }
  0x55   : > { %893 = vmatpush.bf16.msra.mxu3 %v2749_v3  ;;  %v3490_v26 = vld [vmem:[#allocation8 + $0x4] sm:$0xf0]  ;;  %v2733_v27 = vor.u32 %v3542_v24, %v2732_v22  ;;  %v2844_v29 = vld [vmem:[#allocation8 + $0x80] sm:$0xf]  ;;  %3790 = vset.pattern.permute.xlu0 %v4029_v32  ;;  %v2660_v33 = vld [vmem:[#allocation8 + $0x110] sm:$0xf]  ;;  %v4259_v21 = vunpack.c.l.b16 %v4029_v32 }
  0x56   : > { %v2781_v28 = vor.u32 %v3490_v26, %v2780_v25  ;;  %v3506_v30 = vld [vmem:[#allocation8 + $0x84] sm:$0xf0]  ;;  %v3540_v37 = vld [vmem:[#allocation8 + $0x194] sm:$0xf0]  ;;  %v2652_v39 = vld [vmem:[#allocation8 + $0x100] sm:$0xf] }
  0x57   : > { %1118 = vmatpush.bf16.msrb.mxu0 %v2813_v44  ;;  %1137 = vmatpush.bf16.msrb.mxu1 %v2877_v47  ;;  %v2845_v31 = vor.u32 %v3506_v30, %v2844_v29  ;;  %v3522_v40 = vld [vmem:[#allocation8 + $0x104] sm:$0xf0]  ;;  %v2716_v41 = vld [vmem:[#allocation8 + $0x180] sm:$0xf]  ;;  %v482_v45 = vld [vmem:[%s4498_s2] sm:$0x3] }
  0x58   : > { %v2653_v42 = vor.u32 %v3522_v40, %v2652_v39  ;;  %v3538_v43 = vld [vmem:[#allocation8 + $0x184] sm:$0xf0]  ;;  %v2964_v48 = vld [vmem:[#allocation8 + $0x270] sm:$0xf]  ;;  %v3568_v49 = vld [vmem:[#allocation8 + $0x274] sm:$0xf0] }
  0x59   : > { %894 = vmatpush.bf16.msra.mxu3 %v2741_v15  ;;  %v2717_v44 = vor.u32 %v3538_v43, %v2716_v41  ;;  %v3028_v50 = vld [vmem:[#allocation8 + $0x2f0] sm:$0xf]  ;;  %v2965_v51 = vor.u32 %v3568_v49, %v2964_v48  ;;  %v3584_v52 = vld [vmem:[#allocation8 + $0x2f4] sm:$0xf0]  ;;  %v4248_v54 = vperm.slane %v482_v45, 0  ;;  %v4250_v55 = vperm.slane %v482_v45, 1 }
  0x5a   : > { %2643 = vmatmul.msk.bf16.gmra.mxu0 %vm513_vm1, %v3486_v9  ;;  %2647 = vmatmul.msk.bf16.gmra.mxu1 %vm513_vm1, %v3486_v9  ;;  %v3528_v9 = vld [vmem:[#allocation8 + $0x134] sm:$0xf0]  ;;  %v3029_v53 = vor.u32 %v3584_v52, %v3028_v50  ;;  %v3566_v57 = vld [vmem:[#allocation8 + $0x264] sm:$0xf0]  ;;  %v3020_v58 = vld [vmem:[#allocation8 + $0x2e0] sm:$0xf] }
  0x5b   : > { %1119 = vmatpush.bf16.msrb.mxu0 %v2805_v56  ;;  %1138 = vmatpush.bf16.msrb.mxu1 %v2869_v59  ;;  %v2677_v11 = vor.u32 %v3528_v9, %v2676_v8  ;;  %v2956_v56 = vld [vmem:[#allocation8 + $0x260] sm:$0xf]  ;;  %v3582_v60 = vld [vmem:[#allocation8 + $0x2e4] sm:$0xf0]  ;;  %v2710_v5 = vld [vmem:[#allocation8 + $0x178] sm:$0xf0] }
  0x5c   : > { %v2957_v59 = vor.u32 %v3566_v57, %v2956_v56  ;;  %v3021_v61 = vor.u32 %v3582_v60, %v3020_v58  ;;  %v3551_v6 = vld [vmem:[#allocation8 + $0x1f4] sm:$0xf]  ;;  %v2774_v8 = vld [vmem:[#allocation8 + $0x1f8] sm:$0xf0]  ;;  %v2948_v9 = vld [vmem:[#allocation8 + $0x250] sm:$0xf] }
  0x5d   : > { %875 = vmatpush.bf16.msra.mxu2 %v2677_v11  ;;  %895 = vmatpush.bf16.msra.mxu3 %v2733_v27  ;;  %v3564_v10 = vld [vmem:[#allocation8 + $0x254] sm:$0xf0]  ;;  %v2777_v13 = vor.u32 %v3551_v6, %v2774_v8  ;;  %v3012_v15 = vld [vmem:[#allocation8 + $0x2d0] sm:$0xf]  ;;  %v3533_v22 = vld [vmem:[#allocation8 + $0x164] sm:$0xf] }
  0x5e   : > { %v2949_v14 = vor.u32 %v3564_v10, %v2948_v9  ;;  %v3549_v24 = vld [vmem:[#allocation8 + $0x1e4] sm:$0xf]  ;;  %v2766_v26 = vld [vmem:[#allocation8 + $0x1e8] sm:$0xf0]  ;;  %v2940_v27 = vld [vmem:[#allocation8 + $0x240] sm:$0xf] }
  0x5f   : > { %1120 = vmatpush.bf16.msrb.mxu0 %v2797_v4  ;;  %1139 = vmatpush.bf16.msrb.mxu1 %v2861_v7  ;;  %v3535_v4 = vld [vmem:[#allocation8 + $0x174] sm:$0xf]  ;;  %v2694_v43 = vld [vmem:[#allocation8 + $0x158] sm:$0xf0]  ;;  %v2932_v48 = vld [vmem:[#allocation8 + $0x230] sm:$0xf] }
  0x60   : > { %v2713_v7 = vor.u32 %v3535_v4, %v2710_v5  ;;  %v3560_v49 = vld [vmem:[#allocation8 + $0x234] sm:$0xf0]  ;;  %v2996_v56 = vld [vmem:[#allocation8 + $0x2b0] sm:$0xf]  ;;  %v3529_v60 = vld [vmem:[#allocation8 + $0x144] sm:$0xf] }
  0x61   : > { %876 = vmatpush.bf16.msra.mxu2 %v2669_v23  ;;  %v2702_v23 = vld [vmem:[#allocation8 + $0x168] sm:$0xf0]  ;;  %v3576_v57 = vld [vmem:[#allocation8 + $0x2b4] sm:$0xf0]  ;;  %v3558_v4 = vld [vmem:[#allocation8 + $0x224] sm:$0xf0] }
  0x62   : > { %v2705_v25 = vor.u32 %v3533_v22, %v2702_v23  ;;  %v2997_v58 = vor.u32 %v3576_v57, %v2996_v56  ;;  %v2988_v9 = vld [vmem:[#allocation8 + $0x2a0] sm:$0xf]  ;;  %v3574_v10 = vld [vmem:[#allocation8 + $0x2a4] sm:$0xf0]  ;;  %v2742_v22 = vld [vmem:[#allocation8 + $0x1b8] sm:$0xf0] }
  0x63   : > { %1121 = vmatpush.bf16.msrb.mxu0 %v2789_v16  ;;  %1140 = vmatpush.bf16.msrb.mxu1 %v2853_v19  ;;  %v3580_v16 = vld [vmem:[#allocation8 + $0x2d4] sm:$0xf0]  ;;  %v2916_v23 = vld [vmem:[#allocation8 + $0x210] sm:$0xf]  ;;  %s2494_s29 = scalar_lea.sflag [#allocation5], %s4214_s28  ;;  %s3959_s1 = sshra.s32 %s2507_s24, 4  ;;  %s3960_s1 = int_to_ptr.hbm [resolvable:$true] %s3959_s1 }
  0x64   : > { %v3013_v19 = vor.u32 %v3580_v16, %v3012_v15  ;;  %v3527_v16 = vld [vmem:[#allocation8 + $0x134] sm:$0xf]  ;;  %s3961_s18 = scalar_lea.hbm %s3960_s1, 1  ;;  %s3965_s17 = scalar_lea.hbm %s4507_s11, 2 }
  0x65   : > { %p3962_p1 = scmp.ne.s32.totalorder %s3960_s1, %s3961_s18  ;;  %p3966_p9 = scmp.lt.s32.totalorder %s3960_s1, %s4507_s11 }
  0x66   : > { %p3967_p10 = scmp.lt.s32.totalorder %s3965_s17, %s3961_s18 }
  0x67   : > { %1122 = vmatpush.bf16.msrb.mxu0 %v2781_v28  ;;  %1141 = vmatpush.bf16.msrb.mxu1 %v2845_v31  ;;  %v3562_v28 = vld [vmem:[#allocation8 + $0x244] sm:$0xf0]  ;;  %v2769_v31 = vor.u32 %v3549_v24, %v2766_v26  ;;  %v3556_v24 = vld [vmem:[#allocation8 + $0x214] sm:$0xf0]  ;;  %p3963_p4 = pnand %p3962_p1, %p4184_p5 }
  0x68   : > { %v2917_v26 = vor.u32 %v3556_v24, %v2916_v23  ;;  %v3517_v24 = vld [vmem:[#allocation8 + $0xe4] sm:$0xf]  ;;  %p3968_p2 = por %p3967_p10, %p3966_p9 }
  0x69   : > { %p3964_p8 = pneg %p3963_p4 }
  0x6a   : > { %2644 = vmatmul.msk.bf16.gmra.mxu0 %vm513_vm1, %v3487_v34  ;;  %2648 = vmatmul.msk.bf16.gmra.mxu1 %vm513_vm1, %v3487_v34  ;;  %v3524_v34 = vld [vmem:[#allocation8 + $0x114] sm:$0xf0] }
  0x6b   : > { %v2661_v36 = vor.u32 %v3524_v34, %v2660_v33  ;;  %1395 = vmatpush.bf16.msra.mxu0 %v2965_v51  ;;  %1414 = vmatpush.bf16.msra.mxu1 %v3029_v53  ;;  %v2941_v33 = vor.u32 %v3562_v28, %v2940_v27  ;;  %v3004_v34 = vld [vmem:[#allocation8 + $0x2c0] sm:$0xf]  ;;  %v2933_v53 = vor.u32 %v3560_v49, %v2932_v48  ;;  %v2980_v27 = vld [vmem:[#allocation8 + $0x290] sm:$0xf]  ;;  %v3572_v28 = vld [vmem:[#allocation8 + $0x294] sm:$0xf0]  ;;  %p3969_p11 = pnand %p3968_p2, %p3964_p8 }
  0x6c   : > { %v2662_v49 = vld [vmem:[#allocation8 + $0x118] sm:$0xf0] }
  0x6d   : > { %877 = vmatpush.bf16.msra.mxu2 %v2661_v36 }
  0x6f   : > { %1396 = vmatpush.bf16.msra.mxu0 %v2957_v59  ;;  %1415 = vmatpush.bf16.msra.mxu1 %v3021_v61  ;;  %v2686_v61 = vld [vmem:[#allocation8 + $0x148] sm:$0xf0] }
  0x71   : > { %878 = vmatpush.bf16.msra.mxu2 %v2653_v42  ;;  %v3531_v42 = vld [vmem:[#allocation8 + $0x154] sm:$0xf] }
  0x73   : > { %1397 = vmatpush.bf16.msra.mxu0 %v2949_v14  ;;  %1416 = vmatpush.bf16.msra.mxu1 %v3013_v19 }
  0x75   : > { %909 = vmatpush.bf16.msrb.mxu2 %v2713_v7 }
  0x77   : > { %1398 = vmatpush.bf16.msra.mxu0 %v2941_v33  ;;  %v3525_v33 = vld [vmem:[#allocation8 + $0x124] sm:$0xf] }
  0x79   : > { %910 = vmatpush.bf16.msrb.mxu2 %v2705_v25 }
  0x7a   : > { %2645 = vmatmul.msk.bf16.gmra.mxu0 %vm513_vm1, %v3488_v35  ;;  %2649 = vmatmul.msk.bf16.gmra.mxu1 %vm513_vm1, %v3488_v35  ;;  %v2724_v35 = vld [vmem:[#allocation8 + $0x190] sm:$0xf] }
  0x7b   : > { %v2725_v38 = vor.u32 %v3540_v37, %v2724_v35  ;;  %v3578_v35 = vld [vmem:[#allocation8 + $0x2c4] sm:$0xf0]  ;;  %1399 = vmatpush.bf16.msra.mxu0 %v2933_v53 }
  0x7c   : > { %v3005_v37 = vor.u32 %v3578_v35, %v3004_v34  ;;  %v2670_v34 = vld [vmem:[#allocation8 + $0x128] sm:$0xf0]  ;;  %v3541_v35 = vld [vmem:[#allocation8 + $0x1a4] sm:$0xf] }
  0x7d   : > { %896 = vmatpush.bf16.msra.mxu3 %v2725_v38 }
  0x7e   : > { %1417 = vmatpush.bf16.msra.mxu1 %v3005_v37  ;;  %v2908_v37 = vld [vmem:[#allocation8 + $0x200] sm:$0xf] }
  0x81   : > { %897 = vmatpush.bf16.msra.mxu3 %v2717_v44  ;;  %v3547_v44 = vld [vmem:[#allocation8 + $0x1d4] sm:$0xf] }
  0x82   : > { %1418 = vmatpush.bf16.msra.mxu1 %v2997_v58  ;;  %v3521_v58 = vld [vmem:[#allocation8 + $0x104] sm:$0xf] }
  0x85   : > { %928 = vmatpush.bf16.msrb.mxu3 %v2777_v13  ;;  %v2989_v13 = vor.u32 %v3574_v10, %v2988_v9 }
  0x87   : > { %1419 = vmatpush.bf16.msra.mxu1 %v2989_v13 }
  0x89   : > { %929 = vmatpush.bf16.msrb.mxu3 %v2769_v31  ;;  %v2981_v31 = vor.u32 %v3572_v28, %v2980_v27 }
  0x8b   : > { %1420 = vmatpush.bf16.msra.mxu1 %v2981_v31  ;;  %v2822_v31 = vld [vmem:[#allocation8 + $0x58] sm:$0xf0] }
  0xc7   : > { %v542_v46 = vpop.f32.mrf.mxu0  ;;  %v571_v47 = vpop.f32.mrf.mxu1 }
  0xc8   : > { %v543_v62 = vadd.f32 %v542_v46, %v4248_v54  ;;  %v572_v63 = vadd.f32 %v571_v47, %v4250_v55  ;;  %v2697_v46 = vor.u32 %v3531_v42, %v2694_v43  ;;  %v2758_v47 = vld [vmem:[#allocation8 + $0x1d8] sm:$0xf0]  ;;  %v2972_v43 = vld [vmem:[#allocation8 + $0x280] sm:$0xf] }
  0xc9   : > { %v2761_v52 = vor.u32 %v3547_v44, %v2758_v47  ;;  %v3570_v44 = vld [vmem:[#allocation8 + $0x284] sm:$0xf0] }
  0xca   : > { %v591_v17 = vmax.f32 %v543_v62, 0.0  ;;  %v592_v18 = vmax.f32 %v572_v63, 0.0  ;;  %911 = vmatpush.bf16.msrb.mxu2 %v2697_v46  ;;  %v3545_v62 = vld [vmem:[#allocation8 + $0x1c4] sm:$0xf]  ;;  %v2973_v48 = vor.u32 %v3570_v44, %v2972_v43 }
  0xcb   : > { %930 = vmatpush.bf16.msrb.mxu3 %v2761_v52 }
  0xcc   : > { %v607_v45 = vpack.c.bf16 %v592_v18, %v591_v17  ;;  %v2678_v17 = vld [vmem:[#allocation8 + $0x138] sm:$0xf0]  ;;  %v3543_v18 = vld [vmem:[#allocation8 + $0x1b4] sm:$0xf]  ;;  %1421 = vmatpush.bf16.msra.mxu1 %v2973_v48 }
  0xcd   : > { %v2681_v19 = vor.u32 %v3527_v16, %v2678_v17  ;;  %v2745_v25 = vor.u32 %v3543_v18, %v2742_v22  ;;  %v2830_v22 = vld [vmem:[#allocation8 + $0x68] sm:$0xf0] }
  0xce   : > { %v695_v63 = vunpack.c.l.b16 %v607_v45 }
  0xcf   : > { %v544_v0 = vpop.f32.mrf.mxu0  ;;  %v573_v1 = vpop.f32.mrf.mxu1 }
  0xd0   : > { %v545_v2 = vadd.f32 %v544_v0, %v4248_v54  ;;  %v574_v3 = vadd.f32 %v573_v1, %v4250_v55  ;;  %v696_v0 = vunpack.c.h.b16 %v607_v45  ;;  %v2689_v1 = vor.u32 %v3529_v60, %v2686_v61  ;;  %v3523_v45 = vld [vmem:[#allocation8 + $0x114] sm:$0xf]  ;;  %v3537_v61 = vld [vmem:[#allocation8 + $0x184] sm:$0xf] }
  0xd1   : > { %v2665_v56 = vor.u32 %v3523_v45, %v2662_v49 }
  0xd2   : > { %v593_v11 = vmax.f32 %v545_v2, 0.0  ;;  %v594_v12 = vmax.f32 %v574_v3, 0.0  ;;  %v2750_v2 = vld [vmem:[#allocation8 + $0x1c8] sm:$0xf0]  ;;  %v2924_v3 = vld [vmem:[#allocation8 + $0x220] sm:$0xf]  ;;  %912 = vmatpush.bf16.msrb.mxu2 %v2689_v1 }
  0xd3   : > { %v2753_v7 = vor.u32 %v3545_v62, %v2750_v2  ;;  %v2925_v8 = vor.u32 %v3558_v4, %v2924_v3  ;;  %v2718_v62 = vld [vmem:[#allocation8 + $0x188] sm:$0xf0] }
  0xd4   : > { %v4256_v20 = vpack.c.bf16 %v594_v12, %v593_v11 }
  0xd5   : > { %931 = vmatpush.bf16.msrb.mxu3 %v2753_v7  ;;  %1400 = vmatpush.bf16.msra.mxu0 %v2925_v8  ;;  %v2838_v7 = vld [vmem:[#allocation8 + $0x78] sm:$0xf0]  ;;  %v3519_v8 = vld [vmem:[#allocation8 + $0xf4] sm:$0xf] }
  0xd6   : > { %v618_v29 = vunpack.c.l.b16 %v4256_v20  ;;  %v619_v30 = vunpack.c.h.b16 %v4256_v20  ;;  %913 = vmatpush.bf16.msrb.mxu2 %v2681_v19  ;;  %v3501_v19 = vld [vmem:[#allocation8 + $0x64] sm:$0xf]  ;;  %v3567_v20 = vld [vmem:[#allocation8 + $0x274] sm:$0xf] }
  0xd7   : > { %v547_v32 = vpop.f32.mrf.mxu0  ;;  %v576_v36 = vpop.f32.mrf.mxu1  ;;  %v2833_v23 = vor.u32 %v3501_v19, %v2830_v22  ;;  %v2798_v19 = vld [vmem:[#allocation8 + $0x28] sm:$0xf0]  ;;  %v3509_v22 = vld [vmem:[#allocation8 + $0xa4] sm:$0xf] }
  0xd8   : > { %v548_v38 = vadd.f32 %v547_v32, %v4248_v54  ;;  %v577_v39 = vadd.f32 %v576_v36, %v4250_v55  ;;  %v4268_v40 = vpack.c.b16 %v618_v29, %v4259_v21  ;;  %v4273_v41 = vpack.c.b16 %v619_v30, %v4259_v21  ;;  %v2734_v36 = vld [vmem:[#allocation8 + $0x1a8] sm:$0xf0] }
  0xd9   : > { %932 = vmatpush.bf16.msrb.mxu3 %v2745_v25  ;;  %1401 = vmatpush.bf16.msra.mxu0 %v2917_v26  ;;  %v2673_v32 = vor.u32 %v3525_v33, %v2670_v34  ;;  %v2894_v25 = vld [vmem:[#allocation8 + $0xe8] sm:$0xf0]  ;;  %v3499_v26 = vld [vmem:[#allocation8 + $0x54] sm:$0xf]  ;;  %v2886_v34 = vld [vmem:[#allocation8 + $0xd8] sm:$0xf0] }
  0xda   : > { %v595_v50 = vmax.f32 %v548_v38, 0.0  ;;  %v596_v51 = vmax.f32 %v577_v39, 0.0  ;;  %1123 = vmatmul.bf16.vlgmr.msrb.gmra.mxu0 %v4268_v40  ;;  %1142 = vmatmul.bf16.vlgmr.msrb.gmra.mxu1 %v4273_v41  ;;  %v3554_v38 = vld [vmem:[#allocation8 + $0x204] sm:$0xf0]  ;;  %v2737_v39 = vor.u32 %v3541_v35, %v2734_v36  ;;  %v2897_v28 = vor.u32 %v3517_v24, %v2894_v25  ;;  %v3515_v33 = vld [vmem:[#allocation8 + $0xd4] sm:$0xf] }
  0xdb   : > { %v2909_v42 = vor.u32 %v3554_v38, %v2908_v37  ;;  %914 = vmatpush.bf16.msrb.mxu2 %v2673_v32  ;;  %v2825_v44 = vor.u32 %v3499_v26, %v2822_v31  ;;  %v2889_v45 = vor.u32 %v3515_v33, %v2886_v34  ;;  %v3491_v26 = vld [vmem:[#allocation8 + $0x14] sm:$0xf]  ;;  %v2854_v33 = vld [vmem:[#allocation8 + $0x98] sm:$0xf0] }
  0xdc   : > { %v609_v59 = vpack.c.bf16 %v596_v51, %v595_v50  ;;  %v3539_v50 = vld [vmem:[#allocation8 + $0x194] sm:$0xf]  ;;  %v2726_v51 = vld [vmem:[#allocation8 + $0x198] sm:$0xf0] }
  0xdd   : > { %933 = vmatpush.bf16.msrb.mxu3 %v2737_v39  ;;  %1402 = vmatpush.bf16.msra.mxu0 %v2909_v42  ;;  %v2729_v57 = vor.u32 %v3539_v50, %v2726_v51  ;;  %v3507_v31 = vld [vmem:[#allocation8 + $0x94] sm:$0xf] }
  0xde   : > { %v697_v5 = vunpack.c.l.b16 %v609_v59  ;;  %v698_v6 = vunpack.c.h.b16 %v609_v59  ;;  %v2654_v59 = vld [vmem:[#allocation8 + $0x108] sm:$0xf0] }
  0xdf   : > { %v549_v11 = vpop.f32.mrf.mxu0  ;;  %v578_v12 = vpop.f32.mrf.mxu1  ;;  %915 = vmatpush.bf16.msrb.mxu2 %v2665_v56  ;;  %v2657_v60 = vor.u32 %v3521_v58, %v2654_v59  ;;  %v2814_v56 = vld [vmem:[#allocation8 + $0x48] sm:$0xf0]  ;;  %v3513_v58 = vld [vmem:[#allocation8 + $0xc4] sm:$0xf] }
  0xe0   : > { %v4277_v14 = vpack.c.b16 %v697_v5, %v695_v63  ;;  %v4279_v15 = vpack.c.b16 %v698_v6, %v696_v0  ;;  %v550_v52 = vadd.f32 %v549_v11, %v4248_v54  ;;  %v579_v53 = vadd.f32 %v578_v12, %v4250_v55  ;;  %v3503_v6 = vld [vmem:[#allocation8 + $0x74] sm:$0xf]  ;;  %v2902_v12 = vld [vmem:[#allocation8 + $0xf8] sm:$0xf0]  ;;  %v2878_v59 = vld [vmem:[#allocation8 + $0xc8] sm:$0xf0] }
  0xe1   : > { %934 = vmatpush.bf16.msrb.mxu3 %v2729_v57  ;;  %v2721_v63 = vor.u32 %v3537_v61, %v2718_v62  ;;  %v2841_v11 = vor.u32 %v3503_v6, %v2838_v7  ;;  %v2905_v18 = vor.u32 %v3519_v8, %v2902_v12  ;;  %v2881_v61 = vor.u32 %v3513_v58, %v2878_v59  ;;  %v3495_v8 = vld [vmem:[#allocation8 + $0x34] sm:$0xf] }
  0xe2   : > { %879 = vmatmul.bf16.vlgmr.msra.gmra.mxu2 %v4277_v14  ;;  %898 = vmatmul.bf16.vlgmr.msra.gmra.mxu3 %v4279_v15  ;;  %v597_v0 = vmax.f32 %v550_v52, 0.0  ;;  %v598_v1 = vmax.f32 %v579_v53, 0.0  ;;  %v3497_v53 = vld [vmem:[#allocation8 + $0x44] sm:$0xf] }
  0xe3   : > { %916 = vmatpush.bf16.msrb.mxu2 %v2657_v60  ;;  %v2817_v57 = vor.u32 %v3497_v53, %v2814_v56  ;;  %v3581_v53 = vld [vmem:[#allocation8 + $0x2e4] sm:$0xf] }
  0xe4   : > { %v4287_v9 = vpack.c.bf16 %v598_v1, %v597_v0 }
  0xe5   : > { %935 = vmatpush.bf16.msrb.mxu3 %v2721_v63 }
  0xe6   : > { %v620_v35 = vunpack.c.l.b16 %v4287_v9  ;;  %v621_v32 = vunpack.c.h.b16 %v4287_v9  ;;  %v2966_v9 = vld [vmem:[#allocation8 + $0x278] sm:$0xf0] }
  0xe7   : > { %v552_v46 = vpop.f32.mrf.mxu0  ;;  %v581_v47 = vpop.f32.mrf.mxu1  ;;  %1153 = vmatpush.bf16.msra.mxu2 %v2841_v11  ;;  %v3511_v11 = vld [vmem:[#allocation8 + $0xb4] sm:$0xf] }
  0xe8   : > { %v553_v10 = vadd.f32 %v552_v46, %v4248_v54  ;;  %v582_v13 = vadd.f32 %v581_v47, %v4250_v55 }
  0xe9   : > { %1172 = vmatpush.bf16.msra.mxu3 %v2905_v18 }
  0xea   : > { %v599_v36 = vmax.f32 %v553_v10, 0.0  ;;  %v600_v37 = vmax.f32 %v582_v13, 0.0  ;;  %v2806_v10 = vld [vmem:[#allocation8 + $0x38] sm:$0xf0] }
  0xeb   : > { %1154 = vmatpush.bf16.msra.mxu2 %v2833_v23  ;;  %v2809_v12 = vor.u32 %v3495_v8, %v2806_v10  ;;  %v2870_v13 = vld [vmem:[#allocation8 + $0xb8] sm:$0xf0]  ;;  %v2862_v23 = vld [vmem:[#allocation8 + $0xa8] sm:$0xf0] }
  0xec   : > { %v611_v50 = vpack.c.bf16 %v600_v37, %v599_v36  ;;  %v2873_v18 = vor.u32 %v3511_v11, %v2870_v13  ;;  %v2865_v25 = vor.u32 %v3509_v22, %v2862_v23  ;;  %v4325_v36 = vpack.c.b16 %v620_v35, %v618_v29  ;;  %v3006_v8 = vld [vmem:[#allocation8 + $0x2c8] sm:$0xf0]  ;;  %v2934_v13 = vld [vmem:[#allocation8 + $0x238] sm:$0xf0]  ;;  %v3555_v23 = vld [vmem:[#allocation8 + $0x214] sm:$0xf] }
  0xed   : > { %1173 = vmatpush.bf16.msra.mxu3 %v2897_v28  ;;  %v2790_v28 = vld [vmem:[#allocation8 + $0x18] sm:$0xf0]  ;;  %v4331_v37 = vpack.c.b16 %v621_v32, %v619_v30  ;;  %v3583_v30 = vld [vmem:[#allocation8 + $0x2f4] sm:$0xf] }
  0xee   : > { %v699_v62 = vunpack.c.l.b16 %v611_v50  ;;  %v700_v0 = vunpack.c.h.b16 %v611_v50  ;;  %v2793_v34 = vor.u32 %v3491_v26, %v2790_v28  ;;  %v2982_v26 = vld [vmem:[#allocation8 + $0x298] sm:$0xf0] }
  0xef   : > { %v554_v2 = vpop.f32.mrf.mxu0  ;;  %v583_v3 = vpop.f32.mrf.mxu1  ;;  %1155 = vmatpush.bf16.msra.mxu2 %v2825_v44  ;;  %v2782_v44 = vld [vmem:[#allocation8 + $0x8] sm:$0xf0] }
  0xf0   : > { %v555_v4 = vadd.f32 %v554_v2, %v4248_v54  ;;  %v584_v5 = vadd.f32 %v583_v3, %v4250_v55 }
  0xf1   : > { %1174 = vmatpush.bf16.msra.mxu3 %v2889_v45  ;;  %v3505_v45 = vld [vmem:[#allocation8 + $0x84] sm:$0xf] }
  0xf2   : > { %v601_v16 = vmax.f32 %v555_v4, 0.0  ;;  %v602_v17 = vmax.f32 %v584_v5, 0.0 }
  0xf3   : > { %1156 = vmatpush.bf16.msra.mxu2 %v2817_v57  ;;  %v3022_v57 = vld [vmem:[#allocation8 + $0x2e8] sm:$0xf0] }
  0xf4   : > { %v4291_v27 = vpack.c.bf16 %v602_v17, %v601_v16 }
  0xf5   : > { %1175 = vmatpush.bf16.msra.mxu3 %v2881_v61  ;;  %v3563_v61 = vld [vmem:[#allocation8 + $0x254] sm:$0xf] }
  0xf6   : > { %v622_v38 = vunpack.c.l.b16 %v4291_v27  ;;  %v623_v39 = vunpack.c.h.b16 %v4291_v27  ;;  %v2998_v27 = vld [vmem:[#allocation8 + $0x2b8] sm:$0xf0] }
  0xf7   : > { %v557_v42 = vpop.f32.mrf.mxu0  ;;  %v586_v43 = vpop.f32.mrf.mxu1  ;;  %1157 = vmatpush.bf16.msra.mxu2 %v2809_v12  ;;  %v3559_v12 = vld [vmem:[#allocation8 + $0x234] sm:$0xf] }
  0xf8   : > { %v558_v46 = vadd.f32 %v557_v42, %v4248_v54  ;;  %v587_v47 = vadd.f32 %v586_v43, %v4250_v55  ;;  %v4303_v48 = vpack.c.b16 %v622_v38, %v620_v35  ;;  %v4309_v49 = vpack.c.b16 %v623_v39, %v621_v32  ;;  %v3489_v43 = vld [vmem:[#allocation8 + $0x4] sm:$0xf]  ;;  %v3030_v32 = vld [vmem:[#allocation8 + $0x2f8] sm:$0xf0] }
  0xf9   : > { %1176 = vmatpush.bf16.msra.mxu3 %v2873_v18  ;;  %v2857_v42 = vor.u32 %v3507_v31, %v2854_v33  ;;  %v2969_v35 = vor.u32 %v3567_v20, %v2966_v9  ;;  %v3033_v50 = vor.u32 %v3583_v30, %v3030_v32  ;;  %v2926_v18 = vld [vmem:[#allocation8 + $0x228] sm:$0xf0]  ;;  %v3092_v32 = vld [vmem:[#allocation9 + $0x170] sm:$0xf] }
  0xfa   : > { %v603_v51 = vmax.f32 %v558_v46, 0.0  ;;  %v604_v52 = vmax.f32 %v587_v47, 0.0  ;;  %1128 = vmatmul.bf16.gmra.mxu0 %v4303_v48  ;;  %1147 = vmatmul.bf16.gmra.mxu1 %v4309_v49  ;;  %v2846_v46 = vld [vmem:[#allocation8 + $0x88] sm:$0xf0]  ;;  %v2785_v47 = vor.u32 %v3489_v43, %v2782_v44 }
  0xfb   : > { %v2849_v29 = vor.u32 %v3505_v45, %v2846_v46  ;;  %v2910_v33 = vld [vmem:[#allocation8 + $0x208] sm:$0xf0] }
  0xfc   : > { %v613_v60 = vpack.c.bf16 %v604_v52, %v603_v51  ;;  %v3565_v51 = vld [vmem:[#allocation8 + $0x264] sm:$0xf]  ;;  %v2958_v52 = vld [vmem:[#allocation8 + $0x268] sm:$0xf0] }
  0xfd   : > { %1177 = vmatpush.bf16.msra.mxu3 %v2865_v25  ;;  %v2961_v56 = vor.u32 %v3565_v51, %v2958_v52  ;;  %v3571_v25 = vld [vmem:[#allocation8 + $0x294] sm:$0xf]  ;;  %v3156_v51 = vld [vmem:[#allocation9 + $0x1f0] sm:$0xf] }
  0xfe   : > { %v701_v63 = vunpack.c.l.b16 %v613_v60  ;;  %v702_v1 = vunpack.c.h.b16 %v613_v60  ;;  %v3025_v60 = vor.u32 %v3581_v53, %v3022_v57  ;;  %v2985_v31 = vor.u32 %v3571_v25, %v2982_v26  ;;  %v3648_v53 = vld [vmem:[#allocation9 + $0x1f4] sm:$0xf0]  ;;  %v3094_v57 = vld [vmem:[#allocation9 + $0x178] sm:$0xf0]  ;;  %v3643_v25 = vld [vmem:[#allocation9 + $0x1d4] sm:$0xf] }
  0xff   : > { %v559_v2 = vpop.f32.mrf.mxu0  ;;  %v588_v3 = vpop.f32.mrf.mxu1  ;;  %v3142_v26 = vld [vmem:[#allocation9 + $0x1d8] sm:$0xf0] }
 0x100   : > { %v560_v4 = vadd.f32 %v559_v2, %v4248_v54  ;;  %v589_v5 = vadd.f32 %v588_v3, %v4250_v55  ;;  %v4315_v6 = vpack.c.b16 %v701_v63, %v699_v62  ;;  %v4317_v7 = vpack.c.b16 %v702_v1, %v700_v0  ;;  %v3493_v54 = vld [vmem:[#allocation8 + $0x24] sm:$0xf]  ;;  %v2950_v62 = vld [vmem:[#allocation8 + $0x258] sm:$0xf0]  ;;  %v3579_v63 = vld [vmem:[#allocation8 + $0x2d4] sm:$0xf] }
 0x101   : > { %v2801_v55 = vor.u32 %v3493_v54, %v2798_v19  ;;  %1178 = vmatpush.bf16.msra.mxu3 %v2857_v42  ;;  %v3014_v0 = vld [vmem:[#allocation8 + $0x2d8] sm:$0xf0]  ;;  %v2953_v1 = vor.u32 %v3563_v61, %v2950_v62  ;;  %v3561_v3 = vld [vmem:[#allocation8 + $0x244] sm:$0xf] }
 0x102   : > { %v605_v16 = vmax.f32 %v560_v4, 0.0  ;;  %v606_v17 = vmax.f32 %v589_v5, 0.0  ;;  %884 = vmatmul.bf16.gmra.mxu2 %v4315_v6  ;;  %903 = vmatmul.bf16.gmra.mxu3 %v4317_v7  ;;  %v3017_v2 = vor.u32 %v3579_v63, %v3014_v0  ;;  %v2942_v4 = vld [vmem:[#allocation8 + $0x248] sm:$0xf0]  ;;  %v3577_v5 = vld [vmem:[#allocation8 + $0x2c4] sm:$0xf] }
 0x103   : > { %1158 = vmatpush.bf16.msra.mxu2 %v2801_v55  ;;  %v2945_v10 = vor.u32 %v3561_v3, %v2942_v4  ;;  %v3009_v11 = vor.u32 %v3577_v5, %v3006_v8  ;;  %v3573_v54 = vld [vmem:[#allocation8 + $0x2a4] sm:$0xf]  ;;  %v2990_v55 = vld [vmem:[#allocation8 + $0x2a8] sm:$0xf0]  ;;  %v3158_v61 = vld [vmem:[#allocation9 + $0x1f8] sm:$0xf0] }
 0x104   : > { %v614_v24 = vpack.c.bf16 %v606_v17, %v605_v16  ;;  %v2937_v16 = vor.u32 %v3559_v12, %v2934_v13  ;;  %v3557_v17 = vld [vmem:[#allocation8 + $0x224] sm:$0xf]  ;;  %v2993_v22 = vor.u32 %v3573_v54, %v2990_v55  ;;  %v3084_v63 = vld [vmem:[#allocation9 + $0x160] sm:$0xf]  ;;  %v3630_v0 = vld [vmem:[#allocation9 + $0x164] sm:$0xf0] }
 0x105   : > { %1179 = vmatpush.bf16.msra.mxu3 %v2849_v29  ;;  %v2929_v19 = vor.u32 %v3557_v17, %v2926_v18  ;;  %v3646_v3 = vld [vmem:[#allocation9 + $0x1e4] sm:$0xf0]  ;;  %v3629_v4 = vld [vmem:[#allocation9 + $0x164] sm:$0xf]  ;;  %v3086_v5 = vld [vmem:[#allocation9 + $0x168] sm:$0xf0] }
 0x106   : > { %v1225_v58 = vunpack.c.l.b16 %v614_v24  ;;  %v1226_v59 = vunpack.c.h.b16 %v614_v24  ;;  %v2918_v24 = vld [vmem:[#allocation8 + $0x218] sm:$0xf0]  ;;  %v3645_v12 = vld [vmem:[#allocation9 + $0x1e4] sm:$0xf]  ;;  %v3150_v13 = vld [vmem:[#allocation9 + $0x1e8] sm:$0xf0] }
 0x107   : > { %1159 = vmatpush.bf16.msra.mxu2 %v2793_v34  ;;  %v2921_v28 = vor.u32 %v3555_v23, %v2918_v24  ;;  %v2974_v34 = vld [vmem:[#allocation8 + $0x288] sm:$0xf0]  ;;  %v3628_v17 = vld [vmem:[#allocation9 + $0x154] sm:$0xf0]  ;;  %v3140_v18 = vld [vmem:[#allocation9 + $0x1d0] sm:$0xf] }
 0x108   : > { %v3627_v55 = vld [vmem:[#allocation9 + $0x154] sm:$0xf] }
 0x10a   : > { %1403 = vmatmul.bf16.vlgmr.msra.gmra.mxu0 %v4325_v36  ;;  %1422 = vmatmul.bf16.vlgmr.msra.gmra.mxu1 %v4331_v37 }
 0x10b   : > { %1160 = vmatpush.bf16.msra.mxu2 %v2785_v47 }
 0x112   : > { %917 = vmatmul.bf16.vlgmr.msrb.gmra.mxu2 %v4277_v14  ;;  %936 = vmatmul.bf16.vlgmr.msrb.gmra.mxu3 %v4279_v15  ;;  %v1229_v14 = vpack.c.b16 %v1225_v58, %v622_v38  ;;  %v1230_v15 = vpack.c.b16 %v1226_v59, %v623_v39  ;;  %v3575_v38 = vld [vmem:[#allocation8 + $0x2b4] sm:$0xf]  ;;  %v3157_v58 = vor.u32 %v3648_v53, %v3156_v51 }
 0x113   : > { %1433 = vmatpush.bf16.msrb.mxu2 %v2969_v35  ;;  %1452 = vmatpush.bf16.msrb.mxu3 %v3033_v50  ;;  %v3001_v39 = vor.u32 %v3575_v38, %v2998_v27  ;;  %v3632_v50 = vld [vmem:[#allocation9 + $0x174] sm:$0xf0]  ;;  %v3153_v38 = vor.u32 %v3645_v12, %v3150_v13  ;;  %v3623_v51 = vld [vmem:[#allocation9 + $0x134] sm:$0xf]  ;;  %v3637_v12 = vld [vmem:[#allocation9 + $0x1a4] sm:$0xf] }
 0x114   : > { %v3093_v52 = vor.u32 %v3632_v50, %v3092_v32  ;;  %1757 = vmatpush.bf16.msrb.mxu1 %v3157_v58  ;;  %v3640_v50 = vld [vmem:[#allocation9 + $0x1b4] sm:$0xf0]  ;;  %v3118_v13 = vld [vmem:[#allocation9 + $0x1a8] sm:$0xf0] }
 0x116   : > { %1743 = vmatpush.bf16.msrb.mxu0 %v3093_v52  ;;  %v3062_v52 = vld [vmem:[#allocation9 + $0x138] sm:$0xf0] }
 0x117   : > { %1434 = vmatpush.bf16.msrb.mxu2 %v2961_v56  ;;  %1453 = vmatpush.bf16.msrb.mxu3 %v3025_v60  ;;  %v3631_v56 = vld [vmem:[#allocation9 + $0x174] sm:$0xf]  ;;  %v3065_v58 = vor.u32 %v3623_v51, %v3062_v52  ;;  %v3600_v51 = vld [vmem:[#allocation9 + $0x74] sm:$0xf0]  ;;  %v3284_v52 = vld [vmem:[#allocation9 + $0xf0] sm:$0xf] }
 0x118   : > { %v3097_v59 = vor.u32 %v3631_v56, %v3094_v57  ;;  %v3647_v60 = vld [vmem:[#allocation9 + $0x1f4] sm:$0xf] }
 0x119   : > { %v3161_v62 = vor.u32 %v3647_v60, %v3158_v61  ;;  %v3126_v60 = vld [vmem:[#allocation9 + $0x1b8] sm:$0xf0] }
 0x11a   : > { %1408 = vmatmul.bf16.gmra.mxu0 %v1229_v14  ;;  %1427 = vmatmul.bf16.gmra.mxu1 %v1230_v15 }
 0x11b   : > { %1435 = vmatpush.bf16.msrb.mxu2 %v2953_v1  ;;  %1454 = vmatpush.bf16.msrb.mxu3 %v3017_v2  ;;  %v3148_v1 = vld [vmem:[#allocation9 + $0x1e0] sm:$0xf]  ;;  %v3085_v2 = vor.u32 %v3630_v0, %v3084_v63  ;;  %v3622_v63 = vld [vmem:[#allocation9 + $0x124] sm:$0xf0] }
 0x11c   : > { %v3116_v0 = vld [vmem:[#allocation9 + $0x1a0] sm:$0xf] }
 0x11d   : > { %1744 = vmatpush.bf16.msrb.mxu0 %v3085_v2  ;;  %v3638_v2 = vld [vmem:[#allocation9 + $0x1a4] sm:$0xf0] }
 0x11f   : > { %1436 = vmatpush.bf16.msrb.mxu2 %v2945_v10  ;;  %1455 = vmatpush.bf16.msrb.mxu3 %v3009_v11  ;;  %v3149_v10 = vor.u32 %v3646_v3, %v3148_v1  ;;  %v3089_v11 = vor.u32 %v3629_v4, %v3086_v5  ;;  %v3621_v3 = vld [vmem:[#allocation9 + $0x124] sm:$0xf]  ;;  %v3054_v4 = vld [vmem:[#allocation9 + $0x128] sm:$0xf0] }
 0x121   : > { %1758 = vmatpush.bf16.msrb.mxu1 %v3149_v10  ;;  %v3117_v10 = vor.u32 %v3638_v2, %v3116_v0  ;;  %v3286_v0 = vld [vmem:[#allocation9 + $0xf8] sm:$0xf0]  ;;  %v3276_v2 = vld [vmem:[#allocation9 + $0xe0] sm:$0xf] }
 0x122   : > { %922 = vmatmul.bf16.gmra.mxu2 %v4315_v6  ;;  %941 = vmatmul.bf16.gmra.mxu3 %v4317_v7  ;;  %v3553_v6 = vld [vmem:[#allocation8 + $0x204] sm:$0xf] }
 0x123   : > { %1437 = vmatpush.bf16.msrb.mxu2 %v2937_v16  ;;  %1456 = vmatpush.bf16.msrb.mxu3 %v3001_v39  ;;  %v3569_v7 = vld [vmem:[#allocation8 + $0x284] sm:$0xf]  ;;  %v2913_v42 = vor.u32 %v3553_v6, %v2910_v33  ;;  %v3076_v39 = vld [vmem:[#allocation9 + $0x150] sm:$0xf]  ;;  %v3626_v6 = vld [vmem:[#allocation9 + $0x144] sm:$0xf0] }
 0x124   : > { %v2977_v43 = vor.u32 %v3569_v7, %v2974_v34  ;;  %v3077_v54 = vor.u32 %v3628_v17, %v3076_v39  ;;  %v3132_v33 = vld [vmem:[#allocation9 + $0x1c0] sm:$0xf]  ;;  %v3044_v39 = vld [vmem:[#allocation9 + $0x110] sm:$0xf]  ;;  %v3620_v17 = vld [vmem:[#allocation9 + $0x114] sm:$0xf0] }
 0x126   : > { %1745 = vmatpush.bf16.msrb.mxu0 %v3077_v54  ;;  %v3045_v54 = vor.u32 %v3620_v17, %v3044_v39 }
 0x127   : > { %1438 = vmatpush.bf16.msrb.mxu2 %v2929_v19  ;;  %1457 = vmatpush.bf16.msrb.mxu3 %v2993_v22  ;;  %v3644_v19 = vld [vmem:[#allocation9 + $0x1d4] sm:$0xf0]  ;;  %v3078_v22 = vld [vmem:[#allocation9 + $0x158] sm:$0xf0] }
 0x128   : > { %v3141_v23 = vor.u32 %v3644_v19, %v3140_v18  ;;  %v3081_v24 = vor.u32 %v3627_v55, %v3078_v22  ;;  %v3108_v18 = vld [vmem:[#allocation9 + $0x190] sm:$0xf]  ;;  %v3636_v19 = vld [vmem:[#allocation9 + $0x194] sm:$0xf0]  ;;  %v3619_v55 = vld [vmem:[#allocation9 + $0x114] sm:$0xf] }
 0x129   : > { %v3046_v22 = vld [vmem:[#allocation9 + $0x118] sm:$0xf0] }
 0x12a   : > { %1759 = vmatpush.bf16.msrb.mxu1 %v3141_v23 }
 0x12b   : > { %1439 = vmatpush.bf16.msrb.mxu2 %v2921_v28  ;;  %1458 = vmatpush.bf16.msrb.mxu3 %v2985_v31  ;;  %v3145_v28 = vor.u32 %v3643_v25, %v3142_v26  ;;  %v3068_v31 = vld [vmem:[#allocation9 + $0x140] sm:$0xf]  ;;  %v3109_v25 = vor.u32 %v3636_v19, %v3108_v18  ;;  %v3049_v26 = vor.u32 %v3619_v55, %v3046_v22  ;;  %v3278_v18 = vld [vmem:[#allocation9 + $0xe8] sm:$0xf0]  ;;  %v3204_v22 = vld [vmem:[#allocation9 + $0x50] sm:$0xf] }
 0x12f   : > { %1440 = vmatpush.bf16.msrb.mxu2 %v2913_v42  ;;  %1459 = vmatpush.bf16.msrb.mxu3 %v2977_v43  ;;  %v3069_v42 = vor.u32 %v3626_v6, %v3068_v31  ;;  %v3642_v43 = vld [vmem:[#allocation9 + $0x1c4] sm:$0xf0]  ;;  %v3110_v31 = vld [vmem:[#allocation9 + $0x198] sm:$0xf0] }
 0x131   : > { %1746 = vmatpush.bf16.msrb.mxu0 %v3069_v42  ;;  %v3618_v42 = vld [vmem:[#allocation9 + $0x104] sm:$0xf0] }
 0x132   : > { %1161 = vmatmul.bf16.vlgmr.msra.gmra.mxu2 %v4268_v40  ;;  %1180 = vmatmul.bf16.vlgmr.msra.gmra.mxu3 %v4273_v41 }
 0x133   : > { %1771 = vmatpush.bf16.msra.mxu2 %v3097_v59  ;;  %1785 = vmatpush.bf16.msra.mxu3 %v3161_v62  ;;  %v3639_v59 = vld [vmem:[#allocation9 + $0x1b4] sm:$0xf]  ;;  %v3052_v62 = vld [vmem:[#allocation9 + $0x120] sm:$0xf] }
 0x134   : > { %v3129_v61 = vor.u32 %v3639_v59, %v3126_v60  ;;  %v3599_v60 = vld [vmem:[#allocation9 + $0x74] sm:$0xf] }
 0x137   : > { %1772 = vmatpush.bf16.msra.mxu2 %v3089_v11  ;;  %1786 = vmatpush.bf16.msra.mxu3 %v3153_v38  ;;  %v3057_v11 = vor.u32 %v3621_v3, %v3054_v4  ;;  %v3121_v38 = vor.u32 %v3637_v12, %v3118_v13  ;;  %v3614_v3 = vld [vmem:[#allocation9 + $0xe4] sm:$0xf0]  ;;  %v3214_v12 = vld [vmem:[#allocation9 + $0x68] sm:$0xf0]  ;;  %v3613_v13 = vld [vmem:[#allocation9 + $0xe4] sm:$0xf] }
 0x138   : > { %v3281_v55 = vor.u32 %v3613_v13, %v3278_v18  ;;  %v3254_v13 = vld [vmem:[#allocation9 + $0xb8] sm:$0xf0]  ;;  %v3180_v18 = vld [vmem:[#allocation9 + $0x20] sm:$0xf] }
 0x13b   : > { %1773 = vmatpush.bf16.msra.mxu2 %v3081_v24  ;;  %1787 = vmatpush.bf16.msra.mxu3 %v3145_v28  ;;  %v3635_v28 = vld [vmem:[#allocation9 + $0x194] sm:$0xf] }
 0x13c   : > { %v3113_v6 = vor.u32 %v3635_v28, %v3110_v31  ;;  %v3612_v31 = vld [vmem:[#allocation9 + $0xd4] sm:$0xf0] }
 0x142   : > { %1166 = vmatmul.bf16.gmra.mxu2 %v4303_v48  ;;  %1185 = vmatmul.bf16.gmra.mxu3 %v4309_v49 }
 0x152   : > { %1441 = vmatmul.bf16.vlgmr.msrb.gmra.mxu2 %v4325_v36  ;;  %1460 = vmatmul.bf16.vlgmr.msrb.gmra.mxu3 %v4331_v37 }
 0x157   : > { %v4361_v16 = vpop.f32.mrf.mxu0  ;;  %v4363_v27 = vpop.f32.mrf.mxu1 }
 0x15f   : > { %v4369_v53 = vpop.f32.mrf.mxu0  ;;  %v4371_v56 = vpop.f32.mrf.mxu1 }
 0x162   : > { %1446 = vmatmul.bf16.gmra.mxu2 %v1229_v14  ;;  %1465 = vmatmul.bf16.gmra.mxu3 %v1230_v15 }
 0x165   : > { %v880_v44 = vpop.f32.mrf.mxu2  ;;  %v899_v45 = vpop.f32.mrf.mxu3 }
 0x166   : > { %v4349_v46 = vadd.f32 %v899_v45, %v880_v44  ;;  %v3625_v44 = vld [vmem:[#allocation9 + $0x144] sm:$0xf]  ;;  %v3070_v45 = vld [vmem:[#allocation9 + $0x148] sm:$0xf0] }
 0x16d   : > { %v882_v47 = vpop.f32.mrf.mxu2  ;;  %v901_v29 = vpop.f32.mrf.mxu3 }
 0x16e   : > { %v4351_v20 = vadd.f32 %v901_v29, %v882_v47  ;;  %v3133_v47 = vor.u32 %v3642_v43, %v3132_v33  ;;  %v3073_v29 = vor.u32 %v3625_v44, %v3070_v45  ;;  %v3036_v33 = vld [vmem:[#allocation9 + $0x100] sm:$0xf] }
 0x16f   : > { %v3100_v43 = vld [vmem:[#allocation9 + $0x180] sm:$0xf] }
 0x170   : > { %1760 = vmatpush.bf16.msrb.mxu1 %v3133_v47  ;;  %1774 = vmatpush.bf16.msra.mxu2 %v3073_v29  ;;  %v3037_v47 = vor.u32 %v3618_v42, %v3036_v33  ;;  %v3634_v29 = vld [vmem:[#allocation9 + $0x184] sm:$0xf0]  ;;  %v3206_v33 = vld [vmem:[#allocation9 + $0x58] sm:$0xf0] }
 0x174   : > { %1775 = vmatpush.bf16.msra.mxu2 %v3065_v58 }
 0x177   : > { %v4375_v23 = vpop.f32.mrf.mxu0  ;;  %v4377_v24 = vpop.f32.mrf.mxu1 }
 0x178   : > { %1776 = vmatpush.bf16.msra.mxu2 %v3057_v11  ;;  %v3597_v11 = vld [vmem:[#allocation9 + $0x64] sm:$0xf] }
 0x179   : > { %v3217_v17 = vor.u32 %v3597_v11, %v3214_v12  ;;  %v3607_v12 = vld [vmem:[#allocation9 + $0xb4] sm:$0xf] }
 0x17c   : > { %1777 = vmatpush.bf16.msra.mxu2 %v3049_v26  ;;  %v3268_v26 = vld [vmem:[#allocation9 + $0xd0] sm:$0xf] }
 0x17d   : > { %v3269_v42 = vor.u32 %v3612_v31, %v3268_v26  ;;  %v3606_v26 = vld [vmem:[#allocation9 + $0xa4] sm:$0xf0]  ;;  %v3182_v31 = vld [vmem:[#allocation9 + $0x28] sm:$0xf0] }
 0x17f   : > { %v4385_v39 = vpop.f32.mrf.mxu1 }
 0x185   : > { %v885_v40 = vpop.f32.mrf.mxu2  ;;  %v904_v41 = vpop.f32.mrf.mxu3 }
 0x186   : > { %v4353_v9 = vadd.f32 %v904_v41, %v885_v40  ;;  %v3641_v40 = vld [vmem:[#allocation9 + $0x1c4] sm:$0xf]  ;;  %v3134_v41 = vld [vmem:[#allocation9 + $0x1c8] sm:$0xf0] }
 0x18d   : > { %v887_v48 = vpop.f32.mrf.mxu2  ;;  %v906_v49 = vpop.f32.mrf.mxu3 }
 0x18e   : > { %v4355_v30 = vadd.f32 %v906_v49, %v887_v48  ;;  %v3137_v48 = vor.u32 %v3641_v40, %v3134_v41  ;;  %v3060_v49 = vld [vmem:[#allocation9 + $0x130] sm:$0xf]  ;;  %v3617_v40 = vld [vmem:[#allocation9 + $0x104] sm:$0xf]  ;;  %v3038_v41 = vld [vmem:[#allocation9 + $0x108] sm:$0xf0] }
 0x190   : > { %1788 = vmatpush.bf16.msra.mxu3 %v3137_v48  ;;  %v3101_v48 = vor.u32 %v3634_v29, %v3100_v43  ;;  %v3270_v29 = vld [vmem:[#allocation9 + $0xd8] sm:$0xf0] }
 0x194   : > { %1789 = vmatpush.bf16.msra.mxu3 %v3129_v61  ;;  %v3222_v61 = vld [vmem:[#allocation9 + $0x78] sm:$0xf0] }
 0x195   : > { %v918_v36 = vpop.f32.mrf.mxu2  ;;  %v937_v37 = vpop.f32.mrf.mxu3 }
 0x196   : > { %v4357_v35 = vadd.f32 %v937_v37, %v918_v36  ;;  %v3624_v36 = vld [vmem:[#allocation9 + $0x134] sm:$0xf0]  ;;  %v3124_v37 = vld [vmem:[#allocation9 + $0x1b0] sm:$0xf] }
 0x197   : > { %v3061_v32 = vor.u32 %v3624_v36, %v3060_v49  ;;  %v3125_v57 = vor.u32 %v3640_v50, %v3124_v37  ;;  %v3041_v49 = vor.u32 %v3617_v40, %v3038_v41  ;;  %v3633_v36 = vld [vmem:[#allocation9 + $0x184] sm:$0xf]  ;;  %v3102_v37 = vld [vmem:[#allocation9 + $0x188] sm:$0xf0]  ;;  %v3196_v41 = vld [vmem:[#allocation9 + $0x40] sm:$0xf] }
 0x198   : > { %1790 = vmatpush.bf16.msra.mxu3 %v3121_v38  ;;  %v3105_v50 = vor.u32 %v3633_v36, %v3102_v37  ;;  %v4383_v38 = vpop.f32.mrf.mxu0  ;;  %v3610_v37 = vld [vmem:[#allocation9 + $0xc4] sm:$0xf0] }
 0x199   : > { %1747 = vmatpush.bf16.msrb.mxu0 %v3061_v32  ;;  %1761 = vmatpush.bf16.msrb.mxu1 %v3125_v57  ;;  %v3220_v32 = vld [vmem:[#allocation9 + $0x70] sm:$0xf]  ;;  %v3616_v57 = vld [vmem:[#allocation9 + $0xf4] sm:$0xf0] }
 0x19a   : > { %1778 = vmatpush.bf16.msra.mxu2 %v3041_v49  ;;  %v3221_v58 = vor.u32 %v3600_v51, %v3220_v32  ;;  %v3285_v59 = vor.u32 %v3616_v57, %v3284_v52  ;;  %v3260_v49 = vld [vmem:[#allocation9 + $0xc0] sm:$0xf]  ;;  %v3593_v32 = vld [vmem:[#allocation9 + $0x44] sm:$0xf] }
 0x19b   : > { %v3261_v51 = vor.u32 %v3610_v37, %v3260_v49  ;;  %v3609_v57 = vld [vmem:[#allocation9 + $0xc4] sm:$0xf]  ;;  %v3236_v49 = vld [vmem:[#allocation9 + $0x90] sm:$0xf] }
 0x19c   : > { %1791 = vmatpush.bf16.msra.mxu3 %v3113_v6  ;;  %v3595_v6 = vld [vmem:[#allocation9 + $0x54] sm:$0xf] }
 0x19d   : > { %v920_v14 = vpop.f32.mrf.mxu2  ;;  %v939_v15 = vpop.f32.mrf.mxu3  ;;  %1762 = vmatpush.bf16.msrb.mxu1 %v3117_v10  ;;  %v3277_v10 = vor.u32 %v3614_v3, %v3276_v2  ;;  %v3209_v43 = vor.u32 %v3595_v6, %v3206_v33  ;;  %v3608_v2 = vld [vmem:[#allocation9 + $0xb4] sm:$0xf0]  ;;  %v3591_v3 = vld [vmem:[#allocation9 + $0x34] sm:$0xf] }
 0x19e   : > { %v4359_v8 = vadd.f32 %v939_v15, %v920_v14  ;;  %v3053_v15 = vor.u32 %v3622_v63, %v3052_v62  ;;  %v3225_v62 = vor.u32 %v3599_v60, %v3222_v61  ;;  %v3615_v63 = vld [vmem:[#allocation9 + $0xf4] sm:$0xf] }
 0x1a0   : > { %1748 = vmatpush.bf16.msrb.mxu0 %v3053_v15  ;;  %1792 = vmatpush.bf16.msra.mxu3 %v3105_v50  ;;  %v3598_v15 = vld [vmem:[#allocation9 + $0x64] sm:$0xf0]  ;;  %v3198_v50 = vld [vmem:[#allocation9 + $0x48] sm:$0xf0] }
 0x1a1   : > { %1763 = vmatpush.bf16.msrb.mxu1 %v3109_v25  ;;  %1991 = vmatpush.bf16.msrb.mxu2 %v3225_v62  ;;  %v3596_v25 = vld [vmem:[#allocation9 + $0x54] sm:$0xf0]  ;;  %v3201_v52 = vor.u32 %v3593_v32, %v3198_v50  ;;  %v3188_v62 = vld [vmem:[#allocation9 + $0x30] sm:$0xf]  ;;  %v3587_v50 = vld [vmem:[#allocation9 + $0x14] sm:$0xf] }
 0x1a2   : > { %v3205_v28 = vor.u32 %v3596_v25, %v3204_v22  ;;  %v3244_v22 = vld [vmem:[#allocation9 + $0xa0] sm:$0xf]  ;;  %v3604_v32 = vld [vmem:[#allocation9 + $0x94] sm:$0xf0] }
 0x1a3   : > { %v3245_v6 = vor.u32 %v3606_v26, %v3244_v22  ;;  %v3230_v22 = vld [vmem:[#allocation9 + $0x88] sm:$0xf0]  ;;  %v1127_v26 = vadd.f32 %v4369_v53, %v4351_v20 }
 0x1a4   : > { %1749 = vmatpush.bf16.msrb.mxu0 %v3045_v54 }
 0x1a5   : > { %v4365_v7 = vpop.f32.mrf.mxu2  ;;  %v4367_v34 = vpop.f32.mrf.mxu3  ;;  %1764 = vmatpush.bf16.msrb.mxu1 %v3101_v48  ;;  %1992 = vmatpush.bf16.msrb.mxu2 %v3217_v17  ;;  %v3594_v48 = vld [vmem:[#allocation9 + $0x44] sm:$0xf0]  ;;  %v3257_v17 = vor.u32 %v3607_v12, %v3254_v13  ;;  %v3166_v12 = vld [vmem:[#allocation9 + $0x8] sm:$0xf0] }
 0x1a6   : > { %v3197_v36 = vor.u32 %v3594_v48, %v3196_v41  ;;  %v3172_v41 = vld [vmem:[#allocation9 + $0x10] sm:$0xf]  ;;  %v3588_v48 = vld [vmem:[#allocation9 + $0x14] sm:$0xf0] }
 0x1a7   : > { %v3173_v37 = vor.u32 %v3588_v48, %v3172_v41 }
 0x1a8   : > { %1750 = vmatpush.bf16.msrb.mxu0 %v3037_v47  ;;  %v3611_v47 = vld [vmem:[#allocation9 + $0xd4] sm:$0xf] }
 0x1a9   : > { %1977 = vmatpush.bf16.msra.mxu1 %v3285_v59  ;;  %v3273_v40 = vor.u32 %v3611_v47, %v3270_v29  ;;  %1993 = vmatpush.bf16.msrb.mxu2 %v3209_v43  ;;  %v3246_v43 = vld [vmem:[#allocation9 + $0xa8] sm:$0xf0] }
 0x1ac   : > { %1963 = vmatpush.bf16.msra.mxu0 %v3221_v58  ;;  %v3262_v58 = vld [vmem:[#allocation9 + $0xc8] sm:$0xf0] }
 0x1ad   : > { %v925_v1 = vpop.f32.mrf.mxu2  ;;  %v944_v14 = vpop.f32.mrf.mxu3  ;;  %1978 = vmatpush.bf16.msra.mxu1 %v3277_v10  ;;  %v3265_v59 = vor.u32 %v3609_v57, %v3262_v58  ;;  %1994 = vmatpush.bf16.msrb.mxu2 %v3201_v52  ;;  %v3237_v52 = vor.u32 %v3604_v32, %v3236_v49  ;;  %v3603_v58 = vld [vmem:[#allocation9 + $0x94] sm:$0xf] }
 0x1ae   : > { %v4373_v5 = vadd.f32 %v944_v14, %v925_v1  ;;  %v3212_v1 = vld [vmem:[#allocation9 + $0x60] sm:$0xf]  ;;  %v3289_v14 = vor.u32 %v3615_v63, %v3286_v0  ;;  %v3592_v63 = vld [vmem:[#allocation9 + $0x34] sm:$0xf0]  ;;  %v3252_v0 = vld [vmem:[#allocation9 + $0xb0] sm:$0xf] }
 0x1af   : > { %v3213_v4 = vor.u32 %v3598_v15, %v3212_v1  ;;  %v1404_v1 = vpop.f32.mrf.mxu0  ;;  %v3189_v15 = vor.u32 %v3592_v63, %v3188_v62  ;;  %v3253_v10 = vor.u32 %v3608_v2, %v3252_v0 }
 0x1b0   : > { %2005 = vmatpush.bf16.msrb.mxu3 %v3289_v14  ;;  %v1423_v14 = vpop.f32.mrf.mxu1 }
 0x1b1   : > { %1964 = vmatpush.bf16.msra.mxu0 %v3213_v4  ;;  %1979 = vmatpush.bf16.msra.mxu1 %v3269_v42  ;;  %v3190_v4 = vld [vmem:[#allocation9 + $0x38] sm:$0xf0]  ;;  %v3605_v42 = vld [vmem:[#allocation9 + $0xa4] sm:$0xf]  ;;  %v1424_v62 = vadd.f32 %v1423_v14, %v1404_v1  ;;  %v3602_v14 = vld [vmem:[#allocation9 + $0x84] sm:$0xf0] }
 0x1b2   : > { %v3193_v11 = vor.u32 %v3591_v3, %v3190_v4  ;;  %v3249_v47 = vor.u32 %v3605_v42, %v3246_v43  ;;  %v3164_v3 = vld [vmem:[#allocation9] sm:$0xf]  ;;  %v3586_v4 = vld [vmem:[#allocation9 + $0x4] sm:$0xf0] }
 0x1b3   : > { %v3165_v1 = vor.u32 %v3586_v4, %v3164_v3 }
 0x1b4   : > { %2006 = vmatpush.bf16.msrb.mxu3 %v3281_v55  ;;  %v3590_v55 = vld [vmem:[#allocation9 + $0x24] sm:$0xf0]  ;;  %1995 = vmatpush.bf16.msrb.mxu2 %v3193_v11  ;;  %v3585_v11 = vld [vmem:[#allocation9 + $0x4] sm:$0xf] }
 0x1b5   : > { %v4379_v44 = vpop.f32.mrf.mxu2  ;;  %v4381_v45 = vpop.f32.mrf.mxu3  ;;  %1965 = vmatpush.bf16.msra.mxu0 %v3205_v28  ;;  %1980 = vmatpush.bf16.msra.mxu1 %v3261_v51  ;;  %v3181_v25 = vor.u32 %v3590_v55, %v3180_v18  ;;  %v3589_v28 = vld [vmem:[#allocation9 + $0x24] sm:$0xf]  ;;  %v3174_v51 = vld [vmem:[#allocation9 + $0x18] sm:$0xf0]  ;;  %v3169_v55 = vor.u32 %v3585_v11, %v3166_v12 }
 0x1b6   : > { %v3185_v33 = vor.u32 %v3589_v28, %v3182_v31  ;;  %v3177_v57 = vor.u32 %v3587_v50, %v3174_v51  ;;  %v1163_v2 = vadd.f32 %v4379_v44, %v4357_v35  ;;  %v1130_v50 = vadd.f32 %v4375_v23, %v4353_v9 }
 0x1b7   : > { %v1406_v63 = vpop.f32.mrf.mxu0 }
 0x1b8   : > { %2007 = vmatpush.bf16.msrb.mxu3 %v3273_v40  ;;  %1996 = vmatpush.bf16.msrb.mxu2 %v3185_v33  ;;  %v1425_v0 = vpop.f32.mrf.mxu1  ;;  %v1182_v28 = vadd.f32 %v4381_v45, %v1163_v2 }
 0x1b9   : > { %1966 = vmatpush.bf16.msra.mxu0 %v3197_v36  ;;  %1981 = vmatpush.bf16.msra.mxu1 %v3253_v10  ;;  %v1125_v36 = vadd.f32 %v4361_v16, %v4349_v46  ;;  %v1479_v46 = vld [vmem:[%s4500_s4] sm:$0x3]  ;;  %v3228_v10 = vld [vmem:[#allocation9 + $0x80] sm:$0xf]  ;;  %v1426_v42 = vadd.f32 %v1425_v0, %v1406_v63 }
 0x1ba   : > { %v3229_v18 = vor.u32 %v3602_v14, %v3228_v10 }
 0x1bb   : > { %v1144_v16 = vadd.f32 %v4363_v27, %v1125_v36  ;;  %v3601_v27 = vld [vmem:[#allocation9 + $0x84] sm:$0xf] }
 0x1bc   : > { %2008 = vmatpush.bf16.msrb.mxu3 %v3265_v59  ;;  %v3238_v59 = vld [vmem:[#allocation9 + $0x98] sm:$0xf0]  ;;  %1997 = vmatpush.bf16.msrb.mxu2 %v3177_v57  ;;  %v3233_v44 = vor.u32 %v3601_v27, %v3230_v22  ;;  %v3348_v27 = vld [vmem:[#allocation9 + $0x270] sm:$0xf]  ;;  %v3664_v22 = vld [vmem:[#allocation9 + $0x274] sm:$0xf0] }
 0x1bd   : > { %v4387_v54 = vpop.f32.mrf.mxu2  ;;  %v4389_v19 = vpop.f32.mrf.mxu3  ;;  %1967 = vmatpush.bf16.msra.mxu0 %v3189_v15  ;;  %1982 = vmatpush.bf16.msra.mxu1 %v3245_v6  ;;  %v3241_v15 = vor.u32 %v3603_v58, %v3238_v59  ;;  %v1471_v13 = vadd.f32 %v1424_v62, %v1144_v16  ;;  %v4412_v6 = vperm.slane %v1479_v46, 1  ;;  %v1149_v59 = vadd.f32 %v4377_v24, %v1130_v50  ;;  %v3342_v50 = vld [vmem:[#allocation9 + $0x268] sm:$0xf0] }
 0x1be   : > { %v1165_v20 = vadd.f32 %v4387_v54, %v4359_v8  ;;  %v943_v8 = vadd.f32 %v4367_v34, %v4365_v7 }
 0x1bf   : > { %v1409_v41 = vpop.f32.mrf.mxu0 }
 0x1c0   : > { %2009 = vmatpush.bf16.msrb.mxu3 %v3257_v17  ;;  %v4407_v17 = vperm.slane %v1479_v46, 0  ;;  %1998 = vmatpush.bf16.msrb.mxu2 %v3169_v55  ;;  %v1428_v48 = vpop.f32.mrf.mxu1  ;;  %v1184_v51 = vadd.f32 %v4389_v19, %v1165_v20  ;;  %v1132_v46 = vadd.f32 %v4383_v38, %v4355_v30 }
 0x1c1   : > { %1968 = vmatpush.bf16.msra.mxu0 %v3181_v25  ;;  %1983 = vmatpush.bf16.msra.mxu1 %v3237_v52  ;;  %v1429_v58 = vadd.f32 %v1428_v48, %v1409_v41 }
 0x1c2   : > { %v1485_v33 = vadd.f32 %v4407_v17, %v1471_v13  ;;  %v1151_v10 = vadd.f32 %v4385_v39, %v1132_v46  ;;  %v3412_v39 = vld [vmem:[#allocation9 + $0x2f0] sm:$0xf] }
 0x1c4   : > { %2010 = vmatpush.bf16.msrb.mxu3 %v3249_v47  ;;  %v1146_v47 = vadd.f32 %v4371_v56, %v1127_v26  ;;  %v1493_v45 = vmax.f32 %v1485_v33, 0.0  ;;  %v3663_v26 = vld [vmem:[#allocation9 + $0x274] sm:$0xf]  ;;  %v3350_v33 = vld [vmem:[#allocation9 + $0x278] sm:$0xf0] }
 0x1c5   : > { %v4391_v60 = vpop.f32.mrf.mxu2  ;;  %v4393_v61 = vpop.f32.mrf.mxu3  ;;  %1969 = vmatpush.bf16.msra.mxu0 %v3173_v37  ;;  %1984 = vmatpush.bf16.msra.mxu1 %v3229_v18 }
 0x1c6   : > { %v1473_v49 = vadd.f32 %v1426_v42, %v1146_v47  ;;  %v1168_v62 = vadd.f32 %v4391_v60, %v943_v8  ;;  %v3679_v42 = vld [vmem:[#allocation9 + $0x2f4] sm:$0xf]  ;;  %v3349_v47 = vor.u32 %v3664_v22, %v3348_v27  ;;  %v3316_v22 = vld [vmem:[#allocation9 + $0x230] sm:$0xf] }
 0x1c7   : > { %v1411_v9 = vpop.f32.mrf.mxu0 }
 0x1c8   : > { %2011 = vmatpush.bf16.msrb.mxu3 %v3241_v15  ;;  %v1487_v56 = vadd.f32 %v4407_v17, %v1473_v49  ;;  %v1475_v15 = vadd.f32 %v1429_v58, %v1149_v59  ;;  %v1430_v23 = vpop.f32.mrf.mxu1  ;;  %v1187_v3 = vadd.f32 %v4393_v61, %v1168_v62  ;;  %v3353_v49 = vor.u32 %v3663_v26, %v3350_v33  ;;  %v3660_v59 = vld [vmem:[#allocation9 + $0x254] sm:$0xf0] }
 0x1c9   : > { %1970 = vmatpush.bf16.msra.mxu0 %v3165_v1  ;;  %v1431_v24 = vadd.f32 %v1430_v23, %v1411_v9  ;;  %v3659_v9 = vld [vmem:[#allocation9 + $0x254] sm:$0xf]  ;;  %v3672_v26 = vld [vmem:[#allocation9 + $0x2b4] sm:$0xf0] }
 0x1ca   : > { %v1495_v0 = vmax.f32 %v1487_v56, 0.0  ;;  %v1489_v60 = vadd.f32 %v4407_v17, %v1475_v15  ;;  %v3406_v56 = vld [vmem:[#allocation9 + $0x2e8] sm:$0xf0]  ;;  %v3676_v15 = vld [vmem:[#allocation9 + $0x2d4] sm:$0xf0] }
 0x1cb   : > { %v1477_v11 = vadd.f32 %v1431_v24, %v1151_v10  ;;  %v3658_v10 = vld [vmem:[#allocation9 + $0x244] sm:$0xf0] }
 0x1cc   : > { %2012 = vmatpush.bf16.msrb.mxu3 %v3233_v44  ;;  %v1497_v30 = vmax.f32 %v1489_v60, 0.0  ;;  %v3680_v44 = vld [vmem:[#allocation9 + $0x2f4] sm:$0xf0] }
 0x1cd   : > { %v4395_v29 = vpop.f32.mrf.mxu2  ;;  %v4397_v40 = vpop.f32.mrf.mxu3  ;;  %v3413_v20 = vor.u32 %v3680_v44, %v3412_v39  ;;  %v3380_v44 = vld [vmem:[#allocation9 + $0x2b0] sm:$0xf] }
 0x1ce   : > { %v1170_v1 = vadd.f32 %v4395_v29, %v4373_v5 }
 0x1d0   : > { %v1189_v61 = vadd.f32 %v4397_v40, %v1170_v1 }
 0x1d5   : > { %v1442_v25 = vpop.f32.mrf.mxu2  ;;  %v1461_v35 = vpop.f32.mrf.mxu3 }
 0x1d6   : > { %v1462_v31 = vadd.f32 %v1461_v35, %v1442_v25  ;;  %v1491_v25 = vadd.f32 %v4407_v17, %v1477_v11  ;;  %v3404_v17 = vld [vmem:[#allocation9 + $0x2e0] sm:$0xf] }
 0x1d8   : > { %v1472_v43 = vadd.f32 %v1462_v31, %v1182_v28 }
 0x1da   : > { %v1486_v53 = vadd.f32 %v4412_v6, %v1472_v43  ;;  %v3414_v43 = vld [vmem:[#allocation9 + $0x2f8] sm:$0xf0] }
 0x1dc   : > { %v1494_v36 = vmax.f32 %v1486_v53, 0.0  ;;  %v3340_v53 = vld [vmem:[#allocation9 + $0x260] sm:$0xf] }
 0x1dd   : > { %v1444_v37 = vpop.f32.mrf.mxu2  ;;  %v1463_v32 = vpop.f32.mrf.mxu3 }
 0x1de   : > { %v1501_v52 = vpack.c.bf16 %v1494_v36, %v1493_v45  ;;  %v1464_v57 = vadd.f32 %v1463_v32, %v1444_v37  ;;  %v3662_v45 = vld [vmem:[#allocation9 + $0x264] sm:$0xf0]  ;;  %v3417_v36 = vor.u32 %v3679_v42, %v3414_v43  ;;  %v3661_v32 = vld [vmem:[#allocation9 + $0x264] sm:$0xf] }
 0x1df   : > { %v3678_v37 = vld [vmem:[#allocation9 + $0x2e4] sm:$0xf0]  ;;  %v3341_v58 = vor.u32 %v3662_v45, %v3340_v53  ;;  %v3345_v62 = vor.u32 %v3661_v32, %v3342_v50  ;;  %v3372_v53 = vld [vmem:[#allocation9 + $0x2a0] sm:$0xf]  ;;  %v3300_v50 = vld [vmem:[#allocation9 + $0x210] sm:$0xf] }
 0x1e0   : > { %v1474_v54 = vadd.f32 %v1464_v57, %v1184_v51  ;;  %v1575_v35 = vunpack.c.l.b16 %v1501_v52  ;;  %v1576_v5 = vunpack.c.h.b16 %v1501_v52  ;;  %v1499_v51 = vmax.f32 %v1491_v25, 0.0  ;;  %v3677_v57 = vld [vmem:[#allocation9 + $0x2e4] sm:$0xf]  ;;  %v3656_v25 = vld [vmem:[#allocation9 + $0x234] sm:$0xf0] }
 0x1e1   : > { %v3405_v8 = vor.u32 %v3678_v37, %v3404_v17  ;;  %v3317_v33 = vor.u32 %v3656_v25, %v3316_v22  ;;  %v3670_v45 = vld [vmem:[#allocation9 + $0x2a4] sm:$0xf0]  ;;  %v3653_v17 = vld [vmem:[#allocation9 + $0x224] sm:$0xf]  ;;  %v3374_v37 = vld [vmem:[#allocation9 + $0x2a8] sm:$0xf0] }
 0x1e2   : > { %v1488_v63 = vadd.f32 %v4412_v6, %v1474_v54  ;;  %v3332_v54 = vld [vmem:[#allocation9 + $0x250] sm:$0xf]  ;;  %v3373_v32 = vor.u32 %v3670_v45, %v3372_v53  ;;  %v3686_v22 = vld [vmem:[#allocation11 + $0x28] sm:$0xff] }
 0x1e3   : > { %v3333_v24 = vor.u32 %v3660_v59, %v3332_v54  ;;  %v3667_v54 = vld [vmem:[#allocation9 + $0x294] sm:$0xf]  ;;  %v3366_v59 = vld [vmem:[#allocation9 + $0x298] sm:$0xf0]  ;;  %v3694_v25 = vld [vmem:[#allocation11 + $0x68] sm:$0xff] }
 0x1e4   : > { %v1496_v19 = vmax.f32 %v1488_v63, 0.0  ;;  %v3409_v63 = vor.u32 %v3677_v57, %v3406_v56  ;;  %v3364_v56 = vld [vmem:[#allocation9 + $0x290] sm:$0xf] }
 0x1e5   : > { %v1447_v16 = vpop.f32.mrf.mxu2  ;;  %v1466_v2 = vpop.f32.mrf.mxu3 }
 0x1e6   : > { %v4431_v7 = vpack.c.bf16 %v1496_v19, %v1495_v0  ;;  %v1467_v34 = vadd.f32 %v1466_v2, %v1447_v16  ;;  %v3396_v0 = vld [vmem:[#allocation9 + $0x2d0] sm:$0xf]  ;;  %v3334_v2 = vld [vmem:[#allocation9 + $0x258] sm:$0xf0] }
 0x1e7   : > { %v3397_v60 = vor.u32 %v3676_v15, %v3396_v0  ;;  %v3337_v11 = vor.u32 %v3659_v9, %v3334_v2  ;;  %v3292_v0 = vld [vmem:[#allocation9 + $0x200] sm:$0xf]  ;;  %v3650_v15 = vld [vmem:[#allocation9 + $0x204] sm:$0xf0]  ;;  %v3294_v2 = vld [vmem:[#allocation9 + $0x208] sm:$0xf0] }
 0x1e8   : > { %v1476_v4 = vadd.f32 %v1467_v34, %v1187_v3  ;;  %v1506_v23 = vunpack.c.l.b16 %v4431_v7  ;;  %v1507_v19 = vunpack.c.h.b16 %v4431_v7  ;;  %v3675_v3 = vld [vmem:[#allocation9 + $0x2d4] sm:$0xf]  ;;  %v3398_v34 = vld [vmem:[#allocation9 + $0x2d8] sm:$0xf0]  ;;  %v3388_v7 = vld [vmem:[#allocation9 + $0x2c0] sm:$0xf] }
 0x1ea   : > { %v1490_v14 = vadd.f32 %v4412_v6, %v1476_v4  ;;  %v3324_v4 = vld [vmem:[#allocation9 + $0x240] sm:$0xf]  ;;  %v1799_v42 = vpack.c.b16 %v1506_v23, %v4259_v21  ;;  %v1800_v43 = vpack.c.b16 %v1507_v19, %v4259_v21 }
 0x1ec   : > { %v1498_v38 = vmax.f32 %v1490_v14, 0.0 }
 0x1ed   : > { %v1449_v12 = vpop.f32.mrf.mxu2  ;;  %v1468_v13 = vpop.f32.mrf.mxu3 }
 0x1ee   : > { %v1503_v18 = vpack.c.bf16 %v1498_v38, %v1497_v30  ;;  %v1469_v55 = vadd.f32 %v1468_v13, %v1449_v12  ;;  %v3401_v30 = vor.u32 %v3675_v3, %v3398_v34  ;;  %v3674_v38 = vld [vmem:[#allocation9 + $0x2c4] sm:$0xf0]  ;;  %v3657_v12 = vld [vmem:[#allocation9 + $0x244] sm:$0xf]  ;;  %v3326_v13 = vld [vmem:[#allocation9 + $0x248] sm:$0xf0] }
 0x1ef   : > { %v3389_v27 = vor.u32 %v3674_v38, %v3388_v7  ;;  %v3665_v3 = vld [vmem:[#allocation9 + $0x284] sm:$0xf]  ;;  %v3358_v34 = vld [vmem:[#allocation9 + $0x288] sm:$0xf0]  ;;  %v3688_v7 = vld [vmem:[#allocation11 + $0x38] sm:$0xff] }
 0x1f0   : > { %v1577_v29 = vunpack.c.l.b16 %v1503_v18  ;;  %v1578_v28 = vunpack.c.h.b16 %v1503_v18  ;;  %v1478_v31 = vadd.f32 %v1469_v55, %v1189_v61  ;;  %v3673_v61 = vld [vmem:[#allocation9 + $0x2c4] sm:$0xf]  ;;  %v3390_v18 = vld [vmem:[#allocation9 + $0x2c8] sm:$0xf0]  ;;  %v3325_v55 = vor.u32 %v3658_v10, %v3324_v4  ;;  %v3696_v38 = vld [vmem:[#allocation11 + $0x78] sm:$0xff] }
 0x1f1   : > { %v3393_v39 = vor.u32 %v3673_v61, %v3390_v18  ;;  %v3361_v10 = vor.u32 %v3665_v3, %v3358_v34 }
 0x1f2   : > { %v1492_v40 = vadd.f32 %v4412_v6, %v1478_v31  ;;  %v1579_v41 = vpack.c.b16 %v1577_v29, %v1575_v35  ;;  %v1580_v48 = vpack.c.b16 %v1578_v28, %v1576_v5  ;;  %v3329_v35 = vor.u32 %v3657_v12, %v3326_v13  ;;  %v3655_v5 = vld [vmem:[#allocation9 + $0x234] sm:$0xf]  ;;  %v3318_v29 = vld [vmem:[#allocation9 + $0x238] sm:$0xf0] }
 0x1f3   : > { %v3671_v28 = vld [vmem:[#allocation9 + $0x2b4] sm:$0xf]  ;;  %v3382_v31 = vld [vmem:[#allocation9 + $0x2b8] sm:$0xf0] }
 0x1f4   : > { %v1500_v52 = vmax.f32 %v1492_v40, 0.0  ;;  %1751 = vmatmul.bf16.vlgmr.msrb.gmra.mxu0 %v1579_v41  ;;  %1765 = vmatmul.bf16.vlgmr.msrb.gmra.mxu1 %v1580_v48  ;;  %v3308_v40 = vld [vmem:[#allocation9 + $0x220] sm:$0xf]  ;;  %v3687_v12 = vld [vmem:[#allocation11 + $0x30] sm:$0xff] }
 0x1f5   : > { %1779 = vmatmul.bf16.vlgmr.msra.gmra.mxu2 %v1579_v41  ;;  %1793 = vmatmul.bf16.vlgmr.msra.gmra.mxu3 %v1580_v48  ;;  %v3654_v41 = vld [vmem:[#allocation9 + $0x224] sm:$0xf0]  ;;  %v3321_v48 = vor.u32 %v3655_v5, %v3318_v29  ;;  %v3695_v13 = vld [vmem:[#allocation11 + $0x70] sm:$0xff]  ;;  %v3684_v5 = vld [vmem:[#allocation11 + $0x18] sm:$0xff] }
 0x1f6   : > { %v1504_v6 = vpack.c.bf16 %v1500_v52, %v1499_v51  ;;  %2219 = vmatpush.bf16.msrb.mxu0 %v3349_v47  ;;  %2233 = vmatpush.bf16.msrb.mxu1 %v3413_v20  ;;  %v3381_v47 = vor.u32 %v3672_v26, %v3380_v44  ;;  %v3385_v20 = vor.u32 %v3671_v28, %v3382_v31  ;;  %v3652_v51 = vld [vmem:[#allocation9 + $0x214] sm:$0xf0]  ;;  %v3683_v28 = vld [vmem:[#allocation11 + $0x10] sm:$0xff] }
 0x1f7   : > { %2247 = vmatpush.bf16.msra.mxu2 %v3353_v49  ;;  %2261 = vmatpush.bf16.msra.mxu3 %v3417_v36  ;;  %v3310_v49 = vld [vmem:[#allocation9 + $0x228] sm:$0xf0]  ;;  %v3669_v36 = vld [vmem:[#allocation9 + $0x2a4] sm:$0xf]  ;;  %v3309_v21 = vor.u32 %v3654_v41, %v3308_v40  ;;  %v3692_v29 = vld [vmem:[#allocation11 + $0x58] sm:$0xff] }
 0x1f8   : > { %v2053_v46 = vunpack.c.l.b16 %v1504_v6  ;;  %v2054_v16 = vunpack.c.h.b16 %v1504_v6  ;;  %v3313_v52 = vor.u32 %v3653_v17, %v3310_v49  ;;  %v3377_v57 = vor.u32 %v3669_v36, %v3374_v37  ;;  %v3668_v6 = vld [vmem:[#allocation9 + $0x294] sm:$0xf0]  ;;  %v3691_v31 = vld [vmem:[#allocation11 + $0x50] sm:$0xff]  ;;  %v3682_v40 = vld [vmem:[#allocation11 + $0x8] sm:$0xff] }
 0x1f9   : > { %v3690_v41 = vld [vmem:[#allocation11 + $0x48] sm:$0xff]  ;;  %v4030_v37 = vmov 2.0  }
 0x1fa   : > { %2220 = vmatpush.bf16.msrb.mxu0 %v3341_v58  ;;  %2234 = vmatpush.bf16.msrb.mxu1 %v3405_v8  ;;  %v4443_v1 = vpack.c.b16 %v2053_v46, %v1506_v23  ;;  %v4445_v14 = vpack.c.b16 %v2054_v16, %v1507_v19  ;;  %v3651_v58 = vld [vmem:[#allocation9 + $0x214] sm:$0xf]  ;;  %v3302_v8 = vld [vmem:[#allocation9 + $0x218] sm:$0xf0]  ;;  %v3369_v23 = vor.u32 %v3667_v54, %v3366_v59  ;;  %v3356_v19 = vld [vmem:[#allocation9 + $0x280] sm:$0xf]  ;;  %3793 = vrcp.f32 %v4030_v37 }
 0x1fb   : > { %2248 = vmatpush.bf16.msra.mxu2 %v3345_v62  ;;  %2262 = vmatpush.bf16.msra.mxu3 %v3409_v63  ;;  %v3301_v62 = vor.u32 %v3652_v51, %v3300_v50  ;;  %v3365_v63 = vor.u32 %v3668_v6, %v3364_v56  ;;  %v3305_v9 = vor.u32 %v3651_v58, %v3302_v8  ;;  %v3666_v46 = vld [vmem:[#allocation9 + $0x284] sm:$0xf0]  ;;  %v3649_v16 = vld [vmem:[#allocation9 + $0x204] sm:$0xf]  ;;  %v2279_v59 = vld [vmem:[%s4502_s6] sm:$0x3] }
 0x1fc   : > { %v3297_v4 = vor.u32 %v3649_v16, %v3294_v2 }
 0x1fe   : > { %2221 = vmatpush.bf16.msrb.mxu0 %v3333_v24  ;;  %2235 = vmatpush.bf16.msrb.mxu1 %v3397_v60  ;;  %v3293_v24 = vor.u32 %v3650_v15, %v3292_v0  ;;  %v3357_v60 = vor.u32 %v3666_v46, %v3356_v19  ;;  %v2282_v15 = vperm.slane %v2279_v59, 1 }
 0x1ff   : > { %2249 = vmatpush.bf16.msra.mxu2 %v3337_v11  ;;  %2263 = vmatpush.bf16.msra.mxu3 %v3401_v30 }
 0x200   : > { %v3794_v6 = vpop.eup %3793 }
 0x201   : > { %v2302_v16 = vmul.f32 2.0, %v3794_v6  ;;  %vm2306_vm2 = vweird.f32 %v3794_v6 }
 0x202   : > { %2222 = vmatpush.bf16.msrb.mxu0 %v3325_v55  ;;  %2236 = vmatpush.bf16.msrb.mxu1 %v3389_v27 }
 0x203   : > { %2250 = vmatpush.bf16.msra.mxu2 %v3329_v35  ;;  %2264 = vmatpush.bf16.msra.mxu3 %v3393_v39 }
 0x204   : > { %1971 = vmatmul.bf16.vlgmr.msra.gmra.mxu0 %v1799_v42  ;;  %1985 = vmatmul.bf16.vlgmr.msra.gmra.mxu1 %v1800_v43 }
 0x205   : > { %1999 = vmatmul.bf16.vlgmr.msrb.gmra.mxu2 %v1799_v42  ;;  %2013 = vmatmul.bf16.vlgmr.msrb.gmra.mxu3 %v1800_v43 }
 0x206   : > { %2223 = vmatpush.bf16.msrb.mxu0 %v3317_v33  ;;  %2237 = vmatpush.bf16.msrb.mxu1 %v3381_v47 }
 0x207   : > { %2251 = vmatpush.bf16.msra.mxu2 %v3321_v48  ;;  %2265 = vmatpush.bf16.msra.mxu3 %v3385_v20  ;;  %v3681_v48 = vld [vmem:[#allocation11] sm:$0xff] }
 0x208   : > { %v3689_v20 = vld [vmem:[#allocation11 + $0x40] sm:$0xff] }
 0x20a   : > { %2224 = vmatpush.bf16.msrb.mxu0 %v3309_v21  ;;  %2238 = vmatpush.bf16.msrb.mxu1 %v3373_v32  ;;  %v2478_v21 = vld [vmem:[#allocation2] sm:$0x1] }
 0x20b   : > { %2252 = vmatpush.bf16.msra.mxu2 %v3313_v52  ;;  %2266 = vmatpush.bf16.msra.mxu3 %v3377_v57 }
 0x20c   : > { %2481 = vperm.xlu0 %3790, %v2478_v21  }
 0x20e   : > { %2225 = vmatpush.bf16.msrb.mxu0 %v3301_v62  ;;  %2239 = vmatpush.bf16.msrb.mxu1 %v3365_v63 }
 0x20f   : > { %2253 = vmatpush.bf16.msra.mxu2 %v3305_v9  ;;  %2267 = vmatpush.bf16.msra.mxu3 %v3369_v23 }
 0x212   : > { %2226 = vmatpush.bf16.msrb.mxu0 %v3293_v24  ;;  %2240 = vmatpush.bf16.msrb.mxu1 %v3357_v60  ;;  %v2281_v24 = vperm.slane %v2279_v59, 0 }
 0x213   : > { %2254 = vmatpush.bf16.msra.mxu2 %v3297_v4  ;;  %2268 = vmatpush.bf16.msra.mxu3 %v3361_v10 }
 0x215   : > { %2227 = vmatmul.bf16.vlgmr.msrb.gmra.mxu0 %v4443_v1  ;;  %2241 = vmatmul.bf16.vlgmr.msrb.gmra.mxu1 %v4445_v14 }
 0x216   : > { %2255 = vmatmul.bf16.vlgmr.msra.gmra.mxu2 %v4443_v1  ;;  %2269 = vmatmul.bf16.vlgmr.msra.gmra.mxu3 %v4445_v14  ;;  %v3685_v1 = vld [vmem:[#allocation11 + $0x20] sm:$0xff] }
 0x217   : > { %2444 = vmatpush.bf16.msra.mxu0 %v3688_v7  ;;  %2457 = vmatpush.bf16.msra.mxu1 %v3696_v38  ;;  %v3693_v14 = vld [vmem:[#allocation11 + $0x60] sm:$0xff] }
 0x21b   : > { %2445 = vmatpush.bf16.msra.mxu0 %v3687_v12  ;;  %2458 = vmatpush.bf16.msra.mxu1 %v3695_v13 }
 0x21f   : > { %2446 = vmatpush.bf16.msra.mxu0 %v3686_v22  ;;  %2459 = vmatpush.bf16.msra.mxu1 %v3694_v25 }
 0x223   : > { %2447 = vmatpush.bf16.msra.mxu0 %v3685_v1  ;;  %2460 = vmatpush.bf16.msra.mxu1 %v3693_v14 }
 0x227   : > { %2448 = vmatpush.bf16.msra.mxu0 %v3684_v5  ;;  %2461 = vmatpush.bf16.msra.mxu1 %v3692_v29 }
 0x22b   : > { %2449 = vmatpush.bf16.msra.mxu0 %v3683_v28  ;;  %2462 = vmatpush.bf16.msra.mxu1 %v3691_v31 }
 0x22f   : > { %2450 = vmatpush.bf16.msra.mxu0 %v3682_v40  ;;  %2463 = vmatpush.bf16.msra.mxu1 %v3690_v41  ;;  %v3791_v41 = vld [vmem:[%s4504_s8] ss:$0 sm:$0xff] }
 0x233   : > { %2451 = vmatpush.bf16.msra.mxu0 %v3681_v48  ;;  %2464 = vmatpush.bf16.msra.mxu1 %v3689_v20 }
 0x271   : > { %v1752_v11 = vpop.f32.mrf.mxu0  ;;  %v1766_v30 = vpop.f32.mrf.mxu1 }
 0x272   : > { %v1767_v32 = vadd.f32 %v1766_v30, %v1752_v11  ;;  %v2303_v30 = vsub.f32 1.0, %v2302_v16 }
 0x278   : > { %v1780_v61 = vpop.f32.mrf.mxu2  ;;  %v1794_v18 = vpop.f32.mrf.mxu3 }
 0x279   : > { %v1754_v55 = vpop.f32.mrf.mxu0  ;;  %v1768_v27 = vpop.f32.mrf.mxu1  ;;  %v1795_v36 = vadd.f32 %v1794_v18, %v1780_v61 }
 0x27a   : > { %v1769_v51 = vadd.f32 %v1768_v27, %v1754_v55  ;;  %v2304_v55 = vmul.f32 %v3794_v6, %v2303_v30 }
 0x280   : > { %v1782_v35 = vpop.f32.mrf.mxu2  ;;  %v1796_v39 = vpop.f32.mrf.mxu3 }
 0x281   : > { %v1972_v44 = vpop.f32.mrf.mxu0  ;;  %v1986_v26 = vpop.f32.mrf.mxu1  ;;  %v1797_v9 = vadd.f32 %v1796_v39, %v1782_v35  ;;  %v2305_v35 = vadd.f32 %v3794_v6, %v2304_v55 }
 0x282   : > { %v1973_v52 = vadd.f32 %v1972_v44, %v1767_v32  ;;  %v2482_v32 = vpop.permute.xlu0 %2481 }
 0x283   : > { %v2307_v28 = vsel %vm2306_vm2, %v3794_v6, %v2305_v35 }
 0x284   : > { %v1987_v23 = vadd.f32 %v1986_v26, %v1973_v52 }
 0x288   : > { %v2000_v33 = vpop.f32.mrf.mxu2  ;;  %v2014_v42 = vpop.f32.mrf.mxu3 }
 0x289   : > { %v1974_v43 = vpop.f32.mrf.mxu0  ;;  %v1988_v47 = vpop.f32.mrf.mxu1  ;;  %v2001_v50 = vadd.f32 %v2000_v33, %v1795_v36 }
 0x28a   : > { %v1975_v8 = vadd.f32 %v1974_v43, %v1769_v51  ;;  %v2484_v51 = vperm.slane %v2482_v32, 0 }
 0x28b   : > { %v2015_v58 = vadd.f32 %v2014_v42, %v2001_v50  ;;  %v2487_v50 = vlaneseq }
 0x28c   : > { %v1989_v2 = vadd.f32 %v1988_v47, %v1975_v8 }
 0x28d   : > { %v2488_v52 = vand.u32 127, %v2487_v50 }
 0x290   : > { %v2002_v53 = vpop.f32.mrf.mxu2  ;;  %v2016_v45 = vpop.f32.mrf.mxu3 }
 0x291   : > { %v2003_v3 = vadd.f32 %v2002_v53, %v1797_v9 }
 0x292   : > { %v2228_v17 = vpop.f32.mrf.mxu0  ;;  %v2242_v49 = vpop.f32.mrf.mxu1 }
 0x293   : > { %v2243_v54 = vadd.f32 %v2242_v49, %v2228_v17  ;;  %v2017_v7 = vadd.f32 %v2016_v45, %v2003_v3  ;;  %v3792_v17 = vld [vmem:[%s4505_s9] ss:$0 sm:$0xff] }
 0x295   : > { %v2275_v34 = vadd.f32 %v2243_v54, %v1987_v23 }
 0x297   : > { %v2285_v38 = vadd.f32 %v2281_v24, %v2275_v34 }
 0x299   : > { %v2256_v57 = vpop.f32.mrf.mxu2  ;;  %v2270_v56 = vpop.f32.mrf.mxu3  ;;  %v2289_v27 = vmax.f32 %v2285_v38, 0.0 }
 0x29a   : > { %v2271_v62 = vadd.f32 %v2270_v56, %v2256_v57  ;;  %v2230_v63 = vpop.f32.mrf.mxu0  ;;  %v2244_v0 = vpop.f32.mrf.mxu1 }
 0x29b   : > { %v2245_v46 = vadd.f32 %v2244_v0, %v2230_v63 }
 0x29c   : > { %v2276_v19 = vadd.f32 %v2271_v62, %v2015_v58 }
 0x29d   : > { %v2277_v4 = vadd.f32 %v2245_v46, %v1989_v2 }
 0x29e   : > { %v2286_v60 = vadd.f32 %v2282_v15, %v2276_v19 }
 0x29f   : > { %v2287_v61 = vadd.f32 %v2281_v24, %v2277_v4 }
 0x2a0   : > { %v2290_v13 = vmax.f32 %v2286_v60, 0.0 }
 0x2a1   : > { %v2258_v10 = vpop.f32.mrf.mxu2  ;;  %v2272_v11 = vpop.f32.mrf.mxu3  ;;  %v2291_v1 = vmax.f32 %v2287_v61, 0.0 }
 0x2a2   : > { %v2273_v12 = vadd.f32 %v2272_v11, %v2258_v10  ;;  %v2293_v25 = vpack.c.bf16 %v2290_v13, %v2289_v27 }
 0x2a4   : > { %v2278_v18 = vadd.f32 %v2273_v12, %v2017_v7  ;;  %v2295_v44 = vunpack.c.l.bf16 %v2293_v25  ;;  %v2296_v26 = vunpack.c.h.bf16 %v2293_v25 }
 0x2a6   : > { %v2288_v22 = vadd.f32 %v2282_v15, %v2278_v18 }
 0x2a8   : > { %v2292_v14 = vmax.f32 %v2288_v22, 0.0 }
 0x2aa   : > { %v2294_v39 = vpack.c.bf16 %v2292_v14, %v2291_v1 }
 0x2ac   : > { %v2297_v5 = vunpack.c.l.bf16 %v2294_v39  ;;  %v2298_v29 = vunpack.c.h.bf16 %v2294_v39 }
 0x2ae   : > { %v2299_v31 = vadd.f32 %v2297_v5, %v2295_v44  ;;  %v2300_v33 = vadd.f32 %v2298_v29, %v2296_v26 }
 0x2b0   : > { %v2308_v42 = vmul.f32 %v2307_v28, %v2299_v31  ;;  %v2309_v43 = vmul.f32 %v2307_v28, %v2300_v33 }
 0x2b2   : > { %v2310_v47 = vpack.c.bf16 %v2308_v42, %v2308_v42  ;;  %v2311_v40 = vpack.c.bf16 %v2309_v43, %v2309_v43 }
 0x2b4   : > { %2452 = vmatmul.bf16.vlgmr.msra.gmra.mxu0 %v2310_v47  ;;  %2465 = vmatmul.bf16.vlgmr.msra.gmra.mxu1 %v2311_v40 }
 0x331   : > { %v2453_v48 = vpop.f32.mrf.mxu0  ;;  %v2466_v20 = vpop.f32.mrf.mxu1 }
 0x332   : > { %v2454_v53 = vadd.f32 %v3791_v41, %v2453_v48 }
 0x334   : > { %v2467_v45 = vadd.f32 %v2466_v20, %v2454_v53 }
 0x336   : > { %v2470_v49 = vmax.f32 %v2467_v45, 0.0 }
 0x338   : > { %v2475_v36 = vmul.f32 %v3792_v17, %v2470_v49 }
 0x339   : > { %v2455_v37 = vpop.f32.mrf.mxu0  ;;  %v2468_v21 = vpop.f32.mrf.mxu1 }
 0x33a   : > { %2476 = vadd.xlane.f32.xlu0 %v2475_v36 }
 0x3ad   : > { %v2477_v57 = vpop.xlane.xlu0 %2476 }
 0x3ae   : > { %v2485_v56 = vadd.f32 %v2484_v51, %v2477_v57 }
 0x3b0   : > { %v2489_v6 = vperm.slane %v2485_v56, %v2488_v52 }
 0x3b2   : > { %2492 = vst.msk [vmem:[%s471_s14] sm:$0x1] %vm2491_vm3, %v2489_v6 }
 0x3b3   : > { %3972 = shalt.err (!%p3969_p11)
}
 0x3b4   : > { %3715 = dma.vmem_to_hbm [thread:$0]  (%p4184_p5), %s2505_s3, 16, %s2507_s24, %s2494_s29  }
 0x3b5 PF: > { %s2518_s28 = sand.u32 1, %s4007_s19   ;;  %p4526_p12 = scmp.ge.s32.totalorder %s4019_s22, 2 }
 0x3b6   : > { %s2519_s13 = scalar_lea.sflag [#allocation5], %s2518_s28 }
 0x3b7   : > { %p3735_p13 = pnand %p4526_p12, %p4129_p6 }
 0x3b9   : > { %p3736_p0 = pneg %p3735_p13 }
 0x3bb   : > { %4002 = dma.done.wait (%p3736_p0), %s2519_s13, 16  }
 0x3bc   : > { %4004 = vsyncadd (%p3736_p0), %s2519_s13, 4294967280  ;;  %p28_p3 = scmp.ge.s32.totalorder %s4171_s26, 4   ;;  %s4527_s19 = smov %s4011_s20 }
 0x3bd   : > { %s4528_s20 = smov %s4015_s21  ;;  %s4529_s21 = smov %s4180_s27 }
 0x3be   : > { %s4530_s22 = smov %s4171_s26  ;;  %30 = sbr.rel (!%p28_p3) target bundleno = 12 (0xc), region = 129 }
 0x3c3   :  { %2524 = vsyncpa [#allocation4], 1 }
 0x3c4   :  { %2526 = vsyncpa [#allocation4 + $0x1], 1 }
 0x3c5   :  { %2527 = vsyncpa [#allocation7], 1 }
 0x3c6   :  { %2528 = vsyncpa [#allocation10], 1 }
 0x3c7   :  { %2529 = vsyncpa [#allocation5], 1 }
 0x3c8   :  { %2531 = vsyncpa [#allocation5 + $0x1], 1 }

</bundles_post_ra>
